<compile_context>
chip_gen: v7x
topology: tpu7x:2x2x1
jax: 0.10.0
libtpu: 0.0.40
codegen_flags: <defaults>
</compile_context>

<pallas_src>
import math
import jax
import jax.numpy as jnp
from jax import lax
from jax.experimental import pallas as pl
from jax.experimental.pallas import tpu as pltpu


def _lstm_chunk_kernel(x_ref, h0_ref, c0_ref, wx_ref, wh_ref, b_ref,
                       hseq_ref, hf_ref, cf_ref,
                       h_scr, c_scr, gx_scr):
    """One grid step = TT timesteps of one batch tile.

    grid = (num_batch_tiles, T // TT).  Axis 0 ("parallel") indexes batch
    tiles; axis 1 ("arbitrary") is the sequential time-chunk carry.  h/c
    state is carried in VMEM scratch between chunks.  Do NOT reorder the grid
    axes or mark the time axis "parallel": the pl.when(tc == 0)/(tc == last)
    guards and the time-independent hf/cf block indices rely on time being
    the innermost, sequentially executed axis.
    """
    tc = pl.program_id(1)
    n_chunks = pl.num_programs(1)
    TT, tb, IN = x_ref.shape
    H = h0_ref.shape[-1]

    # (Re-)load the incoming state at the start of each batch tile's time loop.
    @pl.when(tc == 0)
    def _():
        h_scr[...] = h0_ref[...].astype(jnp.float32)
        c_scr[...] = c0_ref[...].astype(jnp.float32)

    # Hoisted input projection for the whole chunk: one (TT*tb, IN) x (IN, 4H)
    # MXU matmul with large M, plus the combined bias, f32 accumulation.
    x2d = x_ref[...].reshape(TT * tb, IN).astype(wx_ref.dtype)
    gx = jnp.dot(x2d, wx_ref[...], preferred_element_type=jnp.float32)
    gx = gx + b_ref[...]
    gx_scr[...] = gx.reshape(TT, tb, 4 * H)

    def step(t, carry):
        h, c = carry
        # Recurrent matmul only: K = H (half the fused K), no concatenate,
        # no per-step bias add.
        gates = gx_scr[t] + jnp.dot(h.astype(wh_ref.dtype), wh_ref[...],
                                    preferred_element_type=jnp.float32)
        # PyTorch LSTMCell gate order [i, f, g, o]; with H a multiple of 128
        # these slices are lane-tile-aligned free views.
        i_g = jax.nn.sigmoid(gates[:, 0 * H:1 * H])
        f_g = jax.nn.sigmoid(gates[:, 1 * H:2 * H])
        g_g = jnp.tanh(gates[:, 2 * H:3 * H])
        o_g = jax.nn.sigmoid(gates[:, 3 * H:4 * H])
        c_new = f_g * c + i_g * g_g
        h_new = o_g * jnp.tanh(c_new)
        hseq_ref[t] = h_new.astype(hseq_ref.dtype)
        return h_new, c_new

    # Unrolled time loop over the chunk (gate math stays f32 on the VPU/EUP).
    h, c = lax.fori_loop(0, TT, step, (h_scr[...], c_scr[...]), unroll=True)
    h_scr[...] = h
    c_scr[...] = c

    # Final state written back to HBM only once, on the last chunk.
    @pl.when(tc == n_chunks - 1)
    def _():
        hf_ref[...] = h.astype(hf_ref.dtype)
        cf_ref[...] = c.astype(cf_ref.dtype)


def _default_batch_tile(B):
    if B % 8 != 0:
        return B
    candidates = [t for t in (256, 128, 64, 32, 16, 8) if t <= B and B % t == 0]
    if not candidates:
        return B
    for t in candidates:
        if B // t >= 2:   # keep >= 2 batch tiles so v7x's two TCs both get work
            return t
    return candidates[-1]


def _default_time_chunk(T):
    for tt in (16, 8, 4, 2):
        if tt <= T and T % tt == 0:
            return tt
    return 1


def lstm_sequence_pallas(x_seq, h0, c0, w_x, w_h, b, *,
                         batch_tile=None, time_chunk=None,
                         out_dtype=jnp.float32):
    """Run T LSTMCell steps in one pallas_call.

    x_seq : (T, B, IN)
    h0,c0 : (B, H)  f32
    w_x   : (IN, 4H) = W_ih^T   (input projection, hoisted out of recurrence)
    w_h   : (H, 4H)  = W_hh^T   (recurrent projection)
    b     : (1, 4H)  = b_ih + b_hh (f32)
    returns (h_seq (T,B,H) out_dtype, h_final (B,H) f32, c_final (B,H) f32)

    out_dtype=jnp.bfloat16 halves the (T,B,H) HBM writeback (worth it on
    v5e's single vst slot / lower HBM BW); f32 by default for a tight check.
    """
    T, B, IN = x_seq.shape
    H = h0.shape[-1]
    G = w_x.shape[-1]
    assert w_x.shape == (IN, G) and w_h.shape == (H, G) and G == 4 * H
    assert b.shape == (1, G)

    tb = batch_tile if batch_tile is not None else _default_batch_tile(B)
    assert B % tb == 0
    nb = B // tb
    TT = time_chunk if time_chunk is not None else _default_time_chunk(T)
    assert T % TT == 0
    # TODO(synk): pad T to a multiple of TT for awkward (e.g. prime) lengths
    # instead of falling back to TT=1.
    n_chunks = T // TT

    # Cast x once (outside the kernel) to the weight dtype: with bf16 weights
    # this halves x HBM/VMEM traffic and removes the per-chunk VPU cast.
    x_seq = x_seq.astype(w_x.dtype)

    # VMEM budget from actual buffer sizes (the pipeline double-buffers every
    # operand, including the constant-index weights); capped at 64 MiB so the
    # same configuration remains legal on v7x.
    wsz = jnp.dtype(w_x.dtype).itemsize
    xsz = jnp.dtype(x_seq.dtype).itemsize
    osz = jnp.dtype(out_dtype).itemsize
    est = ((IN * G + H * G) * wsz * 2        # W_x, W_h (double-buffered)
           + G * 4 * 2                       # bias
           + TT * tb * IN * xsz * 2          # x chunk
           + TT * tb * H * osz * 2           # h_seq chunk
           + 4 * tb * H * 4 * 2              # h0, c0, hf, cf tiles
           + (2 * tb * H + TT * tb * G) * 4)  # scratch: h, c, gx
    vmem_limit = int(min(max(1.25 * est + (1 << 20), 8 << 20), 64 << 20))
    # TODO(synk): for very large H (f32 weights approaching the VMEM cap),
    # tile the 4H gate axis with an extra grid dimension.

    kernel = pl.pallas_call(
        _lstm_chunk_kernel,
        out_shape=(
            jax.ShapeDtypeStruct((T, B, H), out_dtype),  # h for every step
            jax.ShapeDtypeStruct((B, H), jnp.float32),   # final h
            jax.ShapeDtypeStruct((B, H), jnp.float32),   # final c
        ),
        grid_spec=pltpu.PrefetchScalarGridSpec(
            num_scalar_prefetch=0,
            grid=(nb, n_chunks),
            in_specs=[
                pl.BlockSpec((TT, tb, IN), lambda bi, tc: (tc, bi, 0)),  # x chunk
                pl.BlockSpec((tb, H), lambda bi, tc: (bi, 0)),           # h0 tile
                pl.BlockSpec((tb, H), lambda bi, tc: (bi, 0)),           # c0 tile
                pl.BlockSpec((IN, G), lambda bi, tc: (0, 0)),            # W_x (VMEM-resident)
                pl.BlockSpec((H, G), lambda bi, tc: (0, 0)),             # W_h (VMEM-resident)
                pl.BlockSpec((1, G), lambda bi, tc: (0, 0)),             # bias (VMEM-resident)
            ],
            out_specs=(
                pl.BlockSpec((TT, tb, H), lambda bi, tc: (tc, bi, 0)),
                pl.BlockSpec((tb, H), lambda bi, tc: (bi, 0)),
                pl.BlockSpec((tb, H), lambda bi, tc: (bi, 0)),
            ),
            scratch_shapes=[
                pltpu.VMEM((tb, H), jnp.float32),         # h carry
                pltpu.VMEM((tb, H), jnp.float32),         # c carry
                pltpu.VMEM((TT, tb, G), jnp.float32),     # chunk input projection
            ],
        ),
        compiler_params=pltpu.CompilerParams(
            # Batch tiles are independent (megacore on v7x); time is a carry.
            dimension_semantics=("parallel", "arbitrary"),
            vmem_limit_bytes=vmem_limit,
        ),
        # TODO(synk): for a per-step (T=1) deployment, alias h0/c0 to
        # h_final/c_final via input_output_aliases and drop the h_seq output.
    )
    return kernel(x_seq, h0, c0, w_x, w_h, b)


class StatefulLSTM:
    """JAX/Pallas port of the PyTorch StatefulLSTM (nn.LSTMCell + carried state)."""

    def __init__(self, in_size, out_size, key, weight_dtype=jnp.float32):
        # weight_dtype=jnp.bfloat16 halves weight VMEM/HBM bytes (recommended
        # on v6e/v7x); MXU accumulation and gate math stay f32 either way.
        # Note: with bf16 weights, rounding error compounds over long T --
        # widen tolerances when comparing against an f32 reference.
        self.in_size = in_size
        self.out_size = out_size
        k = 1.0 / math.sqrt(out_size)
        k1, k2, k3, k4 = jax.random.split(key, 4)
        # PyTorch LSTMCell params: W_ih (4H, IN), W_hh (4H, H), b_ih, b_hh (4H,)
        w_ih = jax.random.uniform(k1, (4 * out_size, in_size), jnp.float32, -k, k)
        w_hh = jax.random.uniform(k2, (4 * out_size, out_size), jnp.float32, -k, k)
        b_ih = jax.random.uniform(k3, (4 * out_size,), jnp.float32, -k, k)
        b_hh = jax.random.uniform(k4, (4 * out_size,), jnp.float32, -k, k)
        # Split/transposed weights: input projection hoisted out of recurrence.
        self.w_x = w_ih.T.astype(weight_dtype)                 # (IN, 4H)
        self.w_h = w_hh.T.astype(weight_dtype)                 # (H, 4H)
        self.b = (b_ih + b_hh).reshape(1, 4 * out_size).astype(jnp.float32)
        self.h = None
        self.c = None

    def reset_state(self):
        self.h = None
        self.c = None

    def _ensure_state(self, batch_size):
        if self.h is None:
            self.h = jnp.zeros((batch_size, self.out_size), jnp.float32)
            self.c = jnp.zeros((batch_size, self.out_size), jnp.float32)

    def __call__(self, x):
        """Single step (matches the PyTorch forward): x is (B, IN)."""
        self._ensure_state(x.shape[0])
        _, self.h, self.c = lstm_sequence_pallas(
            x[None], self.h, self.c, self.w_x, self.w_h, self.b)
        return self.h

    def forward_sequence(self, x_seq):
        """Fused multi-step forward: x_seq is (T, B, IN); returns (T, B, H)."""
        self._ensure_state(x_seq.shape[1])
        h_seq, self.h, self.c = lstm_sequence_pallas(
            x_seq, self.h, self.c, self.w_x, self.w_h, self.b)
        return h_seq


def _reference_lstm(x_seq, h, c, w_x, w_h, b):
    """Pure-JAX reference with PyTorch nn.LSTMCell semantics (per-step loop)."""
    H = h.shape[-1]
    outs = []
    for t in range(x_seq.shape[0]):
        gates = x_seq[t] @ w_x + h @ w_h + b
        i = jax.nn.sigmoid(gates[:, 0 * H:1 * H])
        f = jax.nn.sigmoid(gates[:, 1 * H:2 * H])
        g = jnp.tanh(gates[:, 2 * H:3 * H])
        o = jax.nn.sigmoid(gates[:, 3 * H:4 * H])
        c = f * c + i * g
        h = o * jnp.tanh(c)
        outs.append(h)
    return jnp.stack(outs), h, c


if __name__ == "__main__":
    key = jax.random.PRNGKey(0)
    k_param, k_x, k_step = jax.random.split(key, 3)

    # Small but lane/sublane-dense shapes: H, IN multiples of 128, B multiple of 8.
    T, B, IN, H = 8, 16, 128, 128

    model = StatefulLSTM(IN, H, k_param)   # f32 weights for a tight check

    x_seq = jax.random.normal(k_x, (T, B, IN), jnp.float32)
    x_step = jax.random.normal(k_step, (B, IN), jnp.float32)

    # Fused T-step kernel call, then one stateful single-step call (1 chunk).
    h_seq = model.forward_sequence(x_seq)
    h_last = model(x_step)
    jax.block_until_ready(h_last)

    # Cross-check against the pure-JAX reference of the same math.
    zeros = jnp.zeros((B, H), jnp.float32)
    wx32 = model.w_x.astype(jnp.float32)
    wh32 = model.w_h.astype(jnp.float32)
    hs_ref, h_ref, c_ref = _reference_lstm(x_seq, zeros, zeros, wx32, wh32, model.b)
    _, h2_ref, _ = _reference_lstm(x_step[None], h_ref, c_ref, wx32, wh32, model.b)

    assert jnp.allclose(h_seq, hs_ref, atol=1e-3, rtol=1e-3), "sequence mismatch"
    assert jnp.allclose(h_last, h2_ref, atol=1e-3, rtol=1e-3), "stateful step mismatch"

    print("KERNEL_OK")
</pallas_src>

<mosaic_0001>
module attributes {stable_mosaic.version = 11 : i64} {
  func.func @_lstm_chunk_kernel(%arg0: i32, %arg1: i32, %arg2: memref<8x8x128xf32, #tpu.memory_space<vmem>>, %arg3: memref<8x128xf32, #tpu.memory_space<vmem>>, %arg4: memref<8x128xf32, #tpu.memory_space<vmem>>, %arg5: memref<128x512xf32, #tpu.memory_space<vmem>>, %arg6: memref<128x512xf32, #tpu.memory_space<vmem>>, %arg7: memref<1x512xf32, #tpu.memory_space<vmem>>, %arg8: memref<8x8x128xf32, #tpu.memory_space<vmem>>, %arg9: memref<8x128xf32, #tpu.memory_space<vmem>>, %arg10: memref<8x128xf32, #tpu.memory_space<vmem>>, %arg11: memref<8x128xf32, #tpu.memory_space<vmem>>, %arg12: memref<8x128xf32, #tpu.memory_space<vmem>>, %arg13: memref<8x8x512xf32, #tpu.memory_space<vmem>>) attributes {dimension_semantics = [#tpu.dimension_semantics<parallel>, #tpu.dimension_semantics<arbitrary>], iteration_bounds = array<i64: 2, 1>, scalar_prefetch = 0 : i64, scratch_operands = 3 : i64, tpu.core_type = #tpu.core_type<tc>, window_params = [{transform_indices = @transform_0, window_bounds = array<i64: 8, 8, 128>}, {transform_indices = @transform_1, window_bounds = array<i64: 8, 128>}, {transform_indices = @transform_2, window_bounds = array<i64: 8, 128>}, {pipeline_mode = #tpu.pipeline_mode<synchronous>, transform_indices = @transform_3, window_bounds = array<i64: 128, 512>}, {pipeline_mode = #tpu.pipeline_mode<synchronous>, transform_indices = @transform_4, window_bounds = array<i64: 128, 512>}, {pipeline_mode = #tpu.pipeline_mode<synchronous>, transform_indices = @transform_5, window_bounds = array<i64: 1, 512>}, {transform_indices = @transform_6, window_bounds = array<i64: 8, 8, 128>}, {transform_indices = @transform_7, window_bounds = array<i64: 8, 128>}, {transform_indices = @transform_8, window_bounds = array<i64: 8, 128>}]} {
    %c0_i32 = arith.constant 0 : i32
    %0 = arith.cmpi eq, %arg1, %c0_i32 : i32
    %1 = arith.extui %0 : i1 to i32
    %c0_i32_0 = arith.constant 0 : i32
    %2 = arith.cmpi ne, %1, %c0_i32_0 : i32
    scf.if %2 {
      %c0_101 = arith.constant 0 : index
      %c0_102 = arith.constant 0 : index
      %299 = vector.load %arg3[%c0_101, %c0_102] : memref<8x128xf32, #tpu.memory_space<vmem>>, vector<8x128xf32>
      %c0_103 = arith.constant 0 : index
      %c0_104 = arith.constant 0 : index
      %300 = vector.load %arg11[%c0_103, %c0_104] : memref<8x128xf32, #tpu.memory_space<vmem>>, vector<8x128xf32>
      tpu.vector_store %arg11[%c0_103, %c0_104], %299 {strides = array<i32>} : memref<8x128xf32, #tpu.memory_space<vmem>>, vector<8x128xf32>,
      %c0_105 = arith.constant 0 : index
      %c0_106 = arith.constant 0 : index
      %301 = vector.load %arg4[%c0_105, %c0_106] : memref<8x128xf32, #tpu.memory_space<vmem>>, vector<8x128xf32>
      %c0_107 = arith.constant 0 : index
      %c0_108 = arith.constant 0 : index
      %302 = vector.load %arg12[%c0_107, %c0_108] : memref<8x128xf32, #tpu.memory_space<vmem>>, vector<8x128xf32>
      tpu.vector_store %arg12[%c0_107, %c0_108], %301 {strides = array<i32>} : memref<8x128xf32, #tpu.memory_space<vmem>>, vector<8x128xf32>,
    } else {
    }
    %c0 = arith.constant 0 : index
    %c0_1 = arith.constant 0 : index
    %c0_2 = arith.constant 0 : index
    %3 = vector.load %arg2[%c0, %c0_1, %c0_2] : memref<8x8x128xf32, #tpu.memory_space<vmem>>, vector<8x8x128xf32>
    %4 = vector.shape_cast %3 : vector<8x8x128xf32> to vector<64x128xf32>
    %c0_3 = arith.constant 0 : index
    %c0_4 = arith.constant 0 : index
    %5 = vector.load %arg5[%c0_3, %c0_4] : memref<128x512xf32, #tpu.memory_space<vmem>>, vector<128x512xf32>
    %cst = arith.constant dense<0.000000e+00> : vector<64x512xf32>
    %6 = tpu.matmul %4, %5, %cst {dimension_numbers = #tpu.dot_dimension_numbers<[1], [0], [0], [1], [0, 0, 1, 1], [], []>} : vector<64x128xf32>, vector<128x512xf32>, vector<64x512xf32> -> vector<64x512xf32>
    %c0_5 = arith.constant 0 : index
    %c0_6 = arith.constant 0 : index
    %7 = vector.load %arg7[%c0_5, %c0_6] : memref<1x512xf32, #tpu.memory_space<vmem>>, vector<1x512xf32>
    %8 = vector.broadcast %7 : vector<1x512xf32> to vector<64x512xf32>
    %9 = arith.addf %6, %8 : vector<64x512xf32>
    %10 = vector.shape_cast %9 : vector<64x512xf32> to vector<8x8x512xf32>
    %c0_7 = arith.constant 0 : index
    %c0_8 = arith.constant 0 : index
    %c0_9 = arith.constant 0 : index
    %11 = vector.load %arg13[%c0_7, %c0_8, %c0_9] : memref<8x8x512xf32, #tpu.memory_space<vmem>>, vector<8x8x512xf32>
    tpu.vector_store %arg13[%c0_7, %c0_8, %c0_9], %10 {strides = array<i32>} : memref<8x8x512xf32, #tpu.memory_space<vmem>>, vector<8x8x512xf32>,
    %c0_10 = arith.constant 0 : index
    %c0_11 = arith.constant 0 : index
    %12 = vector.load %arg11[%c0_10, %c0_11] : memref<8x128xf32, #tpu.memory_space<vmem>>, vector<8x128xf32>
    %c0_12 = arith.constant 0 : index
    %c0_13 = arith.constant 0 : index
    %13 = vector.load %arg12[%c0_12, %c0_13] : memref<8x128xf32, #tpu.memory_space<vmem>>, vector<8x128xf32>
    %c0_i32_14 = arith.constant 0 : i32
    %14 = arith.index_cast %c0_i32_14 : i32 to index
    %c0_15 = arith.constant 0 : index
    %c0_16 = arith.constant 0 : index
    %15 = vector.load %arg13[%14, %c0_15, %c0_16] : memref<8x8x512xf32, #tpu.memory_space<vmem>>, vector<1x8x512xf32>
    %16 = vector.shape_cast %15 : vector<1x8x512xf32> to vector<8x512xf32>
    %c0_17 = arith.constant 0 : index
    %c0_18 = arith.constant 0 : index
    %17 = vector.load %arg6[%c0_17, %c0_18] : memref<128x512xf32, #tpu.memory_space<vmem>>, vector<128x512xf32>
    %cst_19 = arith.constant dense<0.000000e+00> : vector<8x512xf32>
    %18 = tpu.matmul %12, %17, %cst_19 {dimension_numbers = #tpu.dot_dimension_numbers<[1], [0], [0], [1], [0, 0, 1, 1], [], []>} : vector<8x128xf32>, vector<128x512xf32>, vector<8x512xf32> -> vector<8x512xf32>
    %19 = arith.addf %16, %18 : vector<8x512xf32>
    %20 = vector.extract_strided_slice %19 {offsets = [0, 0], sizes = [8, 128], strides = [1, 1]} : vector<8x512xf32> to vector<8x128xf32>
    %21 = arith.negf %20 : vector<8x128xf32>
    %22 = math.exp %21 : vector<8x128xf32>
    %cst_20 = arith.constant 1.000000e+00 : f32
    %23 = vector.broadcast %cst_20 : f32 to vector<8x128xf32>
    %24 = arith.addf %23, %22 : vector<8x128xf32>
    %25 = arith.divf %23, %24 : vector<8x128xf32>
    %26 = vector.extract_strided_slice %19 {offsets = [0, 128], sizes = [8, 128], strides = [1, 1]} : vector<8x512xf32> to vector<8x128xf32>
    %27 = arith.negf %26 : vector<8x128xf32>
    %28 = math.exp %27 : vector<8x128xf32>
    %cst_21 = arith.constant 1.000000e+00 : f32
    %29 = vector.broadcast %cst_21 : f32 to vector<8x128xf32>
    %30 = arith.addf %29, %28 : vector<8x128xf32>
    %31 = arith.divf %29, %30 : vector<8x128xf32>
    %32 = vector.extract_strided_slice %19 {offsets = [0, 256], sizes = [8, 128], strides = [1, 1]} : vector<8x512xf32> to vector<8x128xf32>
    %33 = math.tanh %32 : vector<8x128xf32>
    %34 = vector.extract_strided_slice %19 {offsets = [0, 384], sizes = [8, 128], strides = [1, 1]} : vector<8x512xf32> to vector<8x128xf32>
    %35 = arith.negf %34 : vector<8x128xf32>
    %36 = math.exp %35 : vector<8x128xf32>
    %cst_22 = arith.constant 1.000000e+00 : f32
    %37 = vector.broadcast %cst_22 : f32 to vector<8x128xf32>
    %38 = arith.addf %37, %36 : vector<8x128xf32>
    %39 = arith.divf %37, %38 : vector<8x128xf32>
    %40 = arith.mulf %31, %13 : vector<8x128xf32>
    %41 = arith.mulf %25, %33 : vector<8x128xf32>
    %42 = arith.addf %40, %41 : vector<8x128xf32>
    %43 = math.tanh %42 : vector<8x128xf32>
    %44 = arith.mulf %39, %43 : vector<8x128xf32>
    %45 = arith.index_cast %c0_i32_14 : i32 to index
    %c0_23 = arith.constant 0 : index
    %c0_24 = arith.constant 0 : index
    %46 = vector.load %arg8[%45, %c0_23, %c0_24] : memref<8x8x128xf32, #tpu.memory_space<vmem>>, vector<1x8x128xf32>
    %47 = vector.shape_cast %46 : vector<1x8x128xf32> to vector<8x128xf32>
    %48 = vector.shape_cast %44 : vector<8x128xf32> to vector<1x8x128xf32>
    tpu.vector_store %arg8[%45, %c0_23, %c0_24], %48 {strides = array<i32>} : memref<8x8x128xf32, #tpu.memory_space<vmem>>, vector<1x8x128xf32>,
    %c1_i32 = arith.constant 1 : i32
    %49 = arith.index_cast %c1_i32 : i32 to index
    %c0_25 = arith.constant 0 : index
    %c0_26 = arith.constant 0 : index
    %50 = vector.load %arg13[%49, %c0_25, %c0_26] : memref<8x8x512xf32, #tpu.memory_space<vmem>>, vector<1x8x512xf32>
    %51 = vector.shape_cast %50 : vector<1x8x512xf32> to vector<8x512xf32>
    %c0_27 = arith.constant 0 : index
    %c0_28 = arith.constant 0 : index
    %52 = vector.load %arg6[%c0_27, %c0_28] : memref<128x512xf32, #tpu.memory_space<vmem>>, vector<128x512xf32>
    %cst_29 = arith.constant dense<0.000000e+00> : vector<8x512xf32>
    %53 = tpu.matmul %44, %52, %cst_29 {dimension_numbers = #tpu.dot_dimension_numbers<[1], [0], [0], [1], [0, 0, 1, 1], [], []>} : vector<8x128xf32>, vector<128x512xf32>, vector<8x512xf32> -> vector<8x512xf32>
    %54 = arith.addf %51, %53 : vector<8x512xf32>
    %55 = vector.extract_strided_slice %54 {offsets = [0, 0], sizes = [8, 128], strides = [1, 1]} : vector<8x512xf32> to vector<8x128xf32>
    %56 = arith.negf %55 : vector<8x128xf32>
    %57 = math.exp %56 : vector<8x128xf32>
    %cst_30 = arith.constant 1.000000e+00 : f32
    %58 = vector.broadcast %cst_30 : f32 to vector<8x128xf32>
    %59 = arith.addf %58, %57 : vector<8x128xf32>
    %60 = arith.divf %58, %59 : vector<8x128xf32>
    %61 = vector.extract_strided_slice %54 {offsets = [0, 128], sizes = [8, 128], strides = [1, 1]} : vector<8x512xf32> to vector<8x128xf32>
    %62 = arith.negf %61 : vector<8x128xf32>
    %63 = math.exp %62 : vector<8x128xf32>
    %cst_31 = arith.constant 1.000000e+00 : f32
    %64 = vector.broadcast %cst_31 : f32 to vector<8x128xf32>
    %65 = arith.addf %64, %63 : vector<8x128xf32>
    %66 = arith.divf %64, %65 : vector<8x128xf32>
    %67 = vector.extract_strided_slice %54 {offsets = [0, 256], sizes = [8, 128], strides = [1, 1]} : vector<8x512xf32> to vector<8x128xf32>
    %68 = math.tanh %67 : vector<8x128xf32>
    %69 = vector.extract_strided_slice %54 {offsets = [0, 384], sizes = [8, 128], strides = [1, 1]} : vector<8x512xf32> to vector<8x128xf32>
    %70 = arith.negf %69 : vector<8x128xf32>
    %71 = math.exp %70 : vector<8x128xf32>
    %cst_32 = arith.constant 1.000000e+00 : f32
    %72 = vector.broadcast %cst_32 : f32 to vector<8x128xf32>
    %73 = arith.addf %72, %71 : vector<8x128xf32>
    %74 = arith.divf %72, %73 : vector<8x128xf32>
    %75 = arith.mulf %66, %42 : vector<8x128xf32>
    %76 = arith.mulf %60, %68 : vector<8x128xf32>
    %77 = arith.addf %75, %76 : vector<8x128xf32>
    %78 = math.tanh %77 : vector<8x128xf32>
    %79 = arith.mulf %74, %78 : vector<8x128xf32>
    %80 = arith.index_cast %c1_i32 : i32 to index
    %c0_33 = arith.constant 0 : index
    %c0_34 = arith.constant 0 : index
    %81 = vector.load %arg8[%80, %c0_33, %c0_34] : memref<8x8x128xf32, #tpu.memory_space<vmem>>, vector<1x8x128xf32>
    %82 = vector.shape_cast %81 : vector<1x8x128xf32> to vector<8x128xf32>
    %83 = vector.shape_cast %79 : vector<8x128xf32> to vector<1x8x128xf32>
    tpu.vector_store %arg8[%80, %c0_33, %c0_34], %83 {strides = array<i32>} : memref<8x8x128xf32, #tpu.memory_space<vmem>>, vector<1x8x128xf32>,
    %c2_i32 = arith.constant 2 : i32
    %84 = arith.index_cast %c2_i32 : i32 to index
    %c0_35 = arith.constant 0 : index
    %c0_36 = arith.constant 0 : index
    %85 = vector.load %arg13[%84, %c0_35, %c0_36] : memref<8x8x512xf32, #tpu.memory_space<vmem>>, vector<1x8x512xf32>
    %86 = vector.shape_cast %85 : vector<1x8x512xf32> to vector<8x512xf32>
    %c0_37 = arith.constant 0 : index
    %c0_38 = arith.constant 0 : index
    %87 = vector.load %arg6[%c0_37, %c0_38] : memref<128x512xf32, #tpu.memory_space<vmem>>, vector<128x512xf32>
    %cst_39 = arith.constant dense<0.000000e+00> : vector<8x512xf32>
    %88 = tpu.matmul %79, %87, %cst_39 {dimension_numbers = #tpu.dot_dimension_numbers<[1], [0], [0], [1], [0, 0, 1, 1], [], []>} : vector<8x128xf32>, vector<128x512xf32>, vector<8x512xf32> -> vector<8x512xf32>
    %89 = arith.addf %86, %88 : vector<8x512xf32>
    %90 = vector.extract_strided_slice %89 {offsets = [0, 0], sizes = [8, 128], strides = [1, 1]} : vector<8x512xf32> to vector<8x128xf32>
    %91 = arith.negf %90 : vector<8x128xf32>
    %92 = math.exp %91 : vector<8x128xf32>
    %cst_40 = arith.constant 1.000000e+00 : f32
    %93 = vector.broadcast %cst_40 : f32 to vector<8x128xf32>
    %94 = arith.addf %93, %92 : vector<8x128xf32>
    %95 = arith.divf %93, %94 : vector<8x128xf32>
    %96 = vector.extract_strided_slice %89 {offsets = [0, 128], sizes = [8, 128], strides = [1, 1]} : vector<8x512xf32> to vector<8x128xf32>
    %97 = arith.negf %96 : vector<8x128xf32>
    %98 = math.exp %97 : vector<8x128xf32>
    %cst_41 = arith.constant 1.000000e+00 : f32
    %99 = vector.broadcast %cst_41 : f32 to vector<8x128xf32>
    %100 = arith.addf %99, %98 : vector<8x128xf32>
    %101 = arith.divf %99, %100 : vector<8x128xf32>
    %102 = vector.extract_strided_slice %89 {offsets = [0, 256], sizes = [8, 128], strides = [1, 1]} : vector<8x512xf32> to vector<8x128xf32>
    %103 = math.tanh %102 : vector<8x128xf32>
    %104 = vector.extract_strided_slice %89 {offsets = [0, 384], sizes = [8, 128], strides = [1, 1]} : vector<8x512xf32> to vector<8x128xf32>
    %105 = arith.negf %104 : vector<8x128xf32>
    %106 = math.exp %105 : vector<8x128xf32>
    %cst_42 = arith.constant 1.000000e+00 : f32
    %107 = vector.broadcast %cst_42 : f32 to vector<8x128xf32>
    %108 = arith.addf %107, %106 : vector<8x128xf32>
    %109 = arith.divf %107, %108 : vector<8x128xf32>
    %110 = arith.mulf %101, %77 : vector<8x128xf32>
    %111 = arith.mulf %95, %103 : vector<8x128xf32>
    %112 = arith.addf %110, %111 : vector<8x128xf32>
    %113 = math.tanh %112 : vector<8x128xf32>
    %114 = arith.mulf %109, %113 : vector<8x128xf32>
    %115 = arith.index_cast %c2_i32 : i32 to index
    %c0_43 = arith.constant 0 : index
    %c0_44 = arith.constant 0 : index
    %116 = vector.load %arg8[%115, %c0_43, %c0_44] : memref<8x8x128xf32, #tpu.memory_space<vmem>>, vector<1x8x128xf32>
    %117 = vector.shape_cast %116 : vector<1x8x128xf32> to vector<8x128xf32>
    %118 = vector.shape_cast %114 : vector<8x128xf32> to vector<1x8x128xf32>
    tpu.vector_store %arg8[%115, %c0_43, %c0_44], %118 {strides = array<i32>} : memref<8x8x128xf32, #tpu.memory_space<vmem>>, vector<1x8x128xf32>,
    %c3_i32 = arith.constant 3 : i32
    %119 = arith.index_cast %c3_i32 : i32 to index
    %c0_45 = arith.constant 0 : index
    %c0_46 = arith.constant 0 : index
    %120 = vector.load %arg13[%119, %c0_45, %c0_46] : memref<8x8x512xf32, #tpu.memory_space<vmem>>, vector<1x8x512xf32>
    %121 = vector.shape_cast %120 : vector<1x8x512xf32> to vector<8x512xf32>
    %c0_47 = arith.constant 0 : index
    %c0_48 = arith.constant 0 : index
    %122 = vector.load %arg6[%c0_47, %c0_48] : memref<128x512xf32, #tpu.memory_space<vmem>>, vector<128x512xf32>
    %cst_49 = arith.constant dense<0.000000e+00> : vector<8x512xf32>
    %123 = tpu.matmul %114, %122, %cst_49 {dimension_numbers = #tpu.dot_dimension_numbers<[1], [0], [0], [1], [0, 0, 1, 1], [], []>} : vector<8x128xf32>, vector<128x512xf32>, vector<8x512xf32> -> vector<8x512xf32>
    %124 = arith.addf %121, %123 : vector<8x512xf32>
    %125 = vector.extract_strided_slice %124 {offsets = [0, 0], sizes = [8, 128], strides = [1, 1]} : vector<8x512xf32> to vector<8x128xf32>
    %126 = arith.negf %125 : vector<8x128xf32>
    %127 = math.exp %126 : vector<8x128xf32>
    %cst_50 = arith.constant 1.000000e+00 : f32
    %128 = vector.broadcast %cst_50 : f32 to vector<8x128xf32>
    %129 = arith.addf %128, %127 : vector<8x128xf32>
    %130 = arith.divf %128, %129 : vector<8x128xf32>
    %131 = vector.extract_strided_slice %124 {offsets = [0, 128], sizes = [8, 128], strides = [1, 1]} : vector<8x512xf32> to vector<8x128xf32>
    %132 = arith.negf %131 : vector<8x128xf32>
    %133 = math.exp %132 : vector<8x128xf32>
    %cst_51 = arith.constant 1.000000e+00 : f32
    %134 = vector.broadcast %cst_51 : f32 to vector<8x128xf32>
    %135 = arith.addf %134, %133 : vector<8x128xf32>
    %136 = arith.divf %134, %135 : vector<8x128xf32>
    %137 = vector.extract_strided_slice %124 {offsets = [0, 256], sizes = [8, 128], strides = [1, 1]} : vector<8x512xf32> to vector<8x128xf32>
    %138 = math.tanh %137 : vector<8x128xf32>
    %139 = vector.extract_strided_slice %124 {offsets = [0, 384], sizes = [8, 128], strides = [1, 1]} : vector<8x512xf32> to vector<8x128xf32>
    %140 = arith.negf %139 : vector<8x128xf32>
    %141 = math.exp %140 : vector<8x128xf32>
    %cst_52 = arith.constant 1.000000e+00 : f32
    %142 = vector.broadcast %cst_52 : f32 to vector<8x128xf32>
    %143 = arith.addf %142, %141 : vector<8x128xf32>
    %144 = arith.divf %142, %143 : vector<8x128xf32>
    %145 = arith.mulf %136, %112 : vector<8x128xf32>
    %146 = arith.mulf %130, %138 : vector<8x128xf32>
    %147 = arith.addf %145, %146 : vector<8x128xf32>
    %148 = math.tanh %147 : vector<8x128xf32>
    %149 = arith.mulf %144, %148 : vector<8x128xf32>
    %150 = arith.index_cast %c3_i32 : i32 to index
    %c0_53 = arith.constant 0 : index
    %c0_54 = arith.constant 0 : index
    %151 = vector.load %arg8[%150, %c0_53, %c0_54] : memref<8x8x128xf32, #tpu.memory_space<vmem>>, vector<1x8x128xf32>
    %152 = vector.shape_cast %151 : vector<1x8x128xf32> to vector<8x128xf32>
    %153 = vector.shape_cast %149 : vector<8x128xf32> to vector<1x8x128xf32>
    tpu.vector_store %arg8[%150, %c0_53, %c0_54], %153 {strides = array<i32>} : memref<8x8x128xf32, #tpu.memory_space<vmem>>, vector<1x8x128xf32>,
    %c4_i32 = arith.constant 4 : i32
    %154 = arith.index_cast %c4_i32 : i32 to index
    %c0_55 = arith.constant 0 : index
    %c0_56 = arith.constant 0 : index
    %155 = vector.load %arg13[%154, %c0_55, %c0_56] : memref<8x8x512xf32, #tpu.memory_space<vmem>>, vector<1x8x512xf32>
    %156 = vector.shape_cast %155 : vector<1x8x512xf32> to vector<8x512xf32>
    %c0_57 = arith.constant 0 : index
    %c0_58 = arith.constant 0 : index
    %157 = vector.load %arg6[%c0_57, %c0_58] : memref<128x512xf32, #tpu.memory_space<vmem>>, vector<128x512xf32>
    %cst_59 = arith.constant dense<0.000000e+00> : vector<8x512xf32>
    %158 = tpu.matmul %149, %157, %cst_59 {dimension_numbers = #tpu.dot_dimension_numbers<[1], [0], [0], [1], [0, 0, 1, 1], [], []>} : vector<8x128xf32>, vector<128x512xf32>, vector<8x512xf32> -> vector<8x512xf32>
    %159 = arith.addf %156, %158 : vector<8x512xf32>
    %160 = vector.extract_strided_slice %159 {offsets = [0, 0], sizes = [8, 128], strides = [1, 1]} : vector<8x512xf32> to vector<8x128xf32>
    %161 = arith.negf %160 : vector<8x128xf32>
    %162 = math.exp %161 : vector<8x128xf32>
    %cst_60 = arith.constant 1.000000e+00 : f32
    %163 = vector.broadcast %cst_60 : f32 to vector<8x128xf32>
    %164 = arith.addf %163, %162 : vector<8x128xf32>
    %165 = arith.divf %163, %164 : vector<8x128xf32>
    %166 = vector.extract_strided_slice %159 {offsets = [0, 128], sizes = [8, 128], strides = [1, 1]} : vector<8x512xf32> to vector<8x128xf32>
    %167 = arith.negf %166 : vector<8x128xf32>
    %168 = math.exp %167 : vector<8x128xf32>
    %cst_61 = arith.constant 1.000000e+00 : f32
    %169 = vector.broadcast %cst_61 : f32 to vector<8x128xf32>
    %170 = arith.addf %169, %168 : vector<8x128xf32>
    %171 = arith.divf %169, %170 : vector<8x128xf32>
    %172 = vector.extract_strided_slice %159 {offsets = [0, 256], sizes = [8, 128], strides = [1, 1]} : vector<8x512xf32> to vector<8x128xf32>
    %173 = math.tanh %172 : vector<8x128xf32>
    %174 = vector.extract_strided_slice %159 {offsets = [0, 384], sizes = [8, 128], strides = [1, 1]} : vector<8x512xf32> to vector<8x128xf32>
    %175 = arith.negf %174 : vector<8x128xf32>
    %176 = math.exp %175 : vector<8x128xf32>
    %cst_62 = arith.constant 1.000000e+00 : f32
    %177 = vector.broadcast %cst_62 : f32 to vector<8x128xf32>
    %178 = arith.addf %177, %176 : vector<8x128xf32>
    %179 = arith.divf %177, %178 : vector<8x128xf32>
    %180 = arith.mulf %171, %147 : vector<8x128xf32>
    %181 = arith.mulf %165, %173 : vector<8x128xf32>
    %182 = arith.addf %180, %181 : vector<8x128xf32>
    %183 = math.tanh %182 : vector<8x128xf32>
    %184 = arith.mulf %179, %183 : vector<8x128xf32>
    %185 = arith.index_cast %c4_i32 : i32 to index
    %c0_63 = arith.constant 0 : index
    %c0_64 = arith.constant 0 : index
    %186 = vector.load %arg8[%185, %c0_63, %c0_64] : memref<8x8x128xf32, #tpu.memory_space<vmem>>, vector<1x8x128xf32>
    %187 = vector.shape_cast %186 : vector<1x8x128xf32> to vector<8x128xf32>
    %188 = vector.shape_cast %184 : vector<8x128xf32> to vector<1x8x128xf32>
    tpu.vector_store %arg8[%185, %c0_63, %c0_64], %188 {strides = array<i32>} : memref<8x8x128xf32, #tpu.memory_space<vmem>>, vector<1x8x128xf32>,
    %c5_i32 = arith.constant 5 : i32
    %189 = arith.index_cast %c5_i32 : i32 to index
    %c0_65 = arith.constant 0 : index
    %c0_66 = arith.constant 0 : index
    %190 = vector.load %arg13[%189, %c0_65, %c0_66] : memref<8x8x512xf32, #tpu.memory_space<vmem>>, vector<1x8x512xf32>
    %191 = vector.shape_cast %190 : vector<1x8x512xf32> to vector<8x512xf32>
    %c0_67 = arith.constant 0 : index
    %c0_68 = arith.constant 0 : index
    %192 = vector.load %arg6[%c0_67, %c0_68] : memref<128x512xf32, #tpu.memory_space<vmem>>, vector<128x512xf32>
    %cst_69 = arith.constant dense<0.000000e+00> : vector<8x512xf32>
    %193 = tpu.matmul %184, %192, %cst_69 {dimension_numbers = #tpu.dot_dimension_numbers<[1], [0], [0], [1], [0, 0, 1, 1], [], []>} : vector<8x128xf32>, vector<128x512xf32>, vector<8x512xf32> -> vector<8x512xf32>
    %194 = arith.addf %191, %193 : vector<8x512xf32>
    %195 = vector.extract_strided_slice %194 {offsets = [0, 0], sizes = [8, 128], strides = [1, 1]} : vector<8x512xf32> to vector<8x128xf32>
    %196 = arith.negf %195 : vector<8x128xf32>
    %197 = math.exp %196 : vector<8x128xf32>
    %cst_70 = arith.constant 1.000000e+00 : f32
    %198 = vector.broadcast %cst_70 : f32 to vector<8x128xf32>
    %199 = arith.addf %198, %197 : vector<8x128xf32>
    %200 = arith.divf %198, %199 : vector<8x128xf32>
    %201 = vector.extract_strided_slice %194 {offsets = [0, 128], sizes = [8, 128], strides = [1, 1]} : vector<8x512xf32> to vector<8x128xf32>
    %202 = arith.negf %201 : vector<8x128xf32>
    %203 = math.exp %202 : vector<8x128xf32>
    %cst_71 = arith.constant 1.000000e+00 : f32
    %204 = vector.broadcast %cst_71 : f32 to vector<8x128xf32>
    %205 = arith.addf %204, %203 : vector<8x128xf32>
    %206 = arith.divf %204, %205 : vector<8x128xf32>
    %207 = vector.extract_strided_slice %194 {offsets = [0, 256], sizes = [8, 128], strides = [1, 1]} : vector<8x512xf32> to vector<8x128xf32>
    %208 = math.tanh %207 : vector<8x128xf32>
    %209 = vector.extract_strided_slice %194 {offsets = [0, 384], sizes = [8, 128], strides = [1, 1]} : vector<8x512xf32> to vector<8x128xf32>
    %210 = arith.negf %209 : vector<8x128xf32>
    %211 = math.exp %210 : vector<8x128xf32>
    %cst_72 = arith.constant 1.000000e+00 : f32
    %212 = vector.broadcast %cst_72 : f32 to vector<8x128xf32>
    %213 = arith.addf %212, %211 : vector<8x128xf32>
    %214 = arith.divf %212, %213 : vector<8x128xf32>
    %215 = arith.mulf %206, %182 : vector<8x128xf32>
    %216 = arith.mulf %200, %208 : vector<8x128xf32>
    %217 = arith.addf %215, %216 : vector<8x128xf32>
    %218 = math.tanh %217 : vector<8x128xf32>
    %219 = arith.mulf %214, %218 : vector<8x128xf32>
    %220 = arith.index_cast %c5_i32 : i32 to index
    %c0_73 = arith.constant 0 : index
    %c0_74 = arith.constant 0 : index
    %221 = vector.load %arg8[%220, %c0_73, %c0_74] : memref<8x8x128xf32, #tpu.memory_space<vmem>>, vector<1x8x128xf32>
    %222 = vector.shape_cast %221 : vector<1x8x128xf32> to vector<8x128xf32>
    %223 = vector.shape_cast %219 : vector<8x128xf32> to vector<1x8x128xf32>
    tpu.vector_store %arg8[%220, %c0_73, %c0_74], %223 {strides = array<i32>} : memref<8x8x128xf32, #tpu.memory_space<vmem>>, vector<1x8x128xf32>,
    %c6_i32 = arith.constant 6 : i32
    %224 = arith.index_cast %c6_i32 : i32 to index
    %c0_75 = arith.constant 0 : index
    %c0_76 = arith.constant 0 : index
    %225 = vector.load %arg13[%224, %c0_75, %c0_76] : memref<8x8x512xf32, #tpu.memory_space<vmem>>, vector<1x8x512xf32>
    %226 = vector.shape_cast %225 : vector<1x8x512xf32> to vector<8x512xf32>
    %c0_77 = arith.constant 0 : index
    %c0_78 = arith.constant 0 : index
    %227 = vector.load %arg6[%c0_77, %c0_78] : memref<128x512xf32, #tpu.memory_space<vmem>>, vector<128x512xf32>
    %cst_79 = arith.constant dense<0.000000e+00> : vector<8x512xf32>
    %228 = tpu.matmul %219, %227, %cst_79 {dimension_numbers = #tpu.dot_dimension_numbers<[1], [0], [0], [1], [0, 0, 1, 1], [], []>} : vector<8x128xf32>, vector<128x512xf32>, vector<8x512xf32> -> vector<8x512xf32>
    %229 = arith.addf %226, %228 : vector<8x512xf32>
    %230 = vector.extract_strided_slice %229 {offsets = [0, 0], sizes = [8, 128], strides = [1, 1]} : vector<8x512xf32> to vector<8x128xf32>
    %231 = arith.negf %230 : vector<8x128xf32>
    %232 = math.exp %231 : vector<8x128xf32>
    %cst_80 = arith.constant 1.000000e+00 : f32
    %233 = vector.broadcast %cst_80 : f32 to vector<8x128xf32>
    %234 = arith.addf %233, %232 : vector<8x128xf32>
    %235 = arith.divf %233, %234 : vector<8x128xf32>
    %236 = vector.extract_strided_slice %229 {offsets = [0, 128], sizes = [8, 128], strides = [1, 1]} : vector<8x512xf32> to vector<8x128xf32>
    %237 = arith.negf %236 : vector<8x128xf32>
    %238 = math.exp %237 : vector<8x128xf32>
    %cst_81 = arith.constant 1.000000e+00 : f32
    %239 = vector.broadcast %cst_81 : f32 to vector<8x128xf32>
    %240 = arith.addf %239, %238 : vector<8x128xf32>
    %241 = arith.divf %239, %240 : vector<8x128xf32>
    %242 = vector.extract_strided_slice %229 {offsets = [0, 256], sizes = [8, 128], strides = [1, 1]} : vector<8x512xf32> to vector<8x128xf32>
    %243 = math.tanh %242 : vector<8x128xf32>
    %244 = vector.extract_strided_slice %229 {offsets = [0, 384], sizes = [8, 128], strides = [1, 1]} : vector<8x512xf32> to vector<8x128xf32>
    %245 = arith.negf %244 : vector<8x128xf32>
    %246 = math.exp %245 : vector<8x128xf32>
    %cst_82 = arith.constant 1.000000e+00 : f32
    %247 = vector.broadcast %cst_82 : f32 to vector<8x128xf32>
    %248 = arith.addf %247, %246 : vector<8x128xf32>
    %249 = arith.divf %247, %248 : vector<8x128xf32>
    %250 = arith.mulf %241, %217 : vector<8x128xf32>
    %251 = arith.mulf %235, %243 : vector<8x128xf32>
    %252 = arith.addf %250, %251 : vector<8x128xf32>
    %253 = math.tanh %252 : vector<8x128xf32>
    %254 = arith.mulf %249, %253 : vector<8x128xf32>
    %255 = arith.index_cast %c6_i32 : i32 to index
    %c0_83 = arith.constant 0 : index
    %c0_84 = arith.constant 0 : index
    %256 = vector.load %arg8[%255, %c0_83, %c0_84] : memref<8x8x128xf32, #tpu.memory_space<vmem>>, vector<1x8x128xf32>
    %257 = vector.shape_cast %256 : vector<1x8x128xf32> to vector<8x128xf32>
    %258 = vector.shape_cast %254 : vector<8x128xf32> to vector<1x8x128xf32>
    tpu.vector_store %arg8[%255, %c0_83, %c0_84], %258 {strides = array<i32>} : memref<8x8x128xf32, #tpu.memory_space<vmem>>, vector<1x8x128xf32>,
    %c7_i32 = arith.constant 7 : i32
    %259 = arith.index_cast %c7_i32 : i32 to index
    %c0_85 = arith.constant 0 : index
    %c0_86 = arith.constant 0 : index
    %260 = vector.load %arg13[%259, %c0_85, %c0_86] : memref<8x8x512xf32, #tpu.memory_space<vmem>>, vector<1x8x512xf32>
    %261 = vector.shape_cast %260 : vector<1x8x512xf32> to vector<8x512xf32>
    %c0_87 = arith.constant 0 : index
    %c0_88 = arith.constant 0 : index
    %262 = vector.load %arg6[%c0_87, %c0_88] : memref<128x512xf32, #tpu.memory_space<vmem>>, vector<128x512xf32>
    %cst_89 = arith.constant dense<0.000000e+00> : vector<8x512xf32>
    %263 = tpu.matmul %254, %262, %cst_89 {dimension_numbers = #tpu.dot_dimension_numbers<[1], [0], [0], [1], [0, 0, 1, 1], [], []>} : vector<8x128xf32>, vector<128x512xf32>, vector<8x512xf32> -> vector<8x512xf32>
    %264 = arith.addf %261, %263 : vector<8x512xf32>
    %265 = vector.extract_strided_slice %264 {offsets = [0, 0], sizes = [8, 128], strides = [1, 1]} : vector<8x512xf32> to vector<8x128xf32>
    %266 = arith.negf %265 : vector<8x128xf32>
    %267 = math.exp %266 : vector<8x128xf32>
    %cst_90 = arith.constant 1.000000e+00 : f32
    %268 = vector.broadcast %cst_90 : f32 to vector<8x128xf32>
    %269 = arith.addf %268, %267 : vector<8x128xf32>
    %270 = arith.divf %268, %269 : vector<8x128xf32>
    %271 = vector.extract_strided_slice %264 {offsets = [0, 128], sizes = [8, 128], strides = [1, 1]} : vector<8x512xf32> to vector<8x128xf32>
    %272 = arith.negf %271 : vector<8x128xf32>
    %273 = math.exp %272 : vector<8x128xf32>
    %cst_91 = arith.constant 1.000000e+00 : f32
    %274 = vector.broadcast %cst_91 : f32 to vector<8x128xf32>
    %275 = arith.addf %274, %273 : vector<8x128xf32>
    %276 = arith.divf %274, %275 : vector<8x128xf32>
    %277 = vector.extract_strided_slice %264 {offsets = [0, 256], sizes = [8, 128], strides = [1, 1]} : vector<8x512xf32> to vector<8x128xf32>
    %278 = math.tanh %277 : vector<8x128xf32>
    %279 = vector.extract_strided_slice %264 {offsets = [0, 384], sizes = [8, 128], strides = [1, 1]} : vector<8x512xf32> to vector<8x128xf32>
    %280 = arith.negf %279 : vector<8x128xf32>
    %281 = math.exp %280 : vector<8x128xf32>
    %cst_92 = arith.constant 1.000000e+00 : f32
    %282 = vector.broadcast %cst_92 : f32 to vector<8x128xf32>
    %283 = arith.addf %282, %281 : vector<8x128xf32>
    %284 = arith.divf %282, %283 : vector<8x128xf32>
    %285 = arith.mulf %276, %252 : vector<8x128xf32>
    %286 = arith.mulf %270, %278 : vector<8x128xf32>
    %287 = arith.addf %285, %286 : vector<8x128xf32>
    %288 = math.tanh %287 : vector<8x128xf32>
    %289 = arith.mulf %284, %288 : vector<8x128xf32>
    %290 = arith.index_cast %c7_i32 : i32 to index
    %c0_93 = arith.constant 0 : index
    %c0_94 = arith.constant 0 : index
    %291 = vector.load %arg8[%290, %c0_93, %c0_94] : memref<8x8x128xf32, #tpu.memory_space<vmem>>, vector<1x8x128xf32>
    %292 = vector.shape_cast %291 : vector<1x8x128xf32> to vector<8x128xf32>
    %293 = vector.shape_cast %289 : vector<8x128xf32> to vector<1x8x128xf32>
    tpu.vector_store %arg8[%290, %c0_93, %c0_94], %293 {strides = array<i32>} : memref<8x8x128xf32, #tpu.memory_space<vmem>>, vector<1x8x128xf32>,
    %c8_i32 = arith.constant 8 : i32
    %c0_95 = arith.constant 0 : index
    %c0_96 = arith.constant 0 : index
    %294 = vector.load %arg11[%c0_95, %c0_96] : memref<8x128xf32, #tpu.memory_space<vmem>>, vector<8x128xf32>
    tpu.vector_store %arg11[%c0_95, %c0_96], %289 {strides = array<i32>} : memref<8x128xf32, #tpu.memory_space<vmem>>, vector<8x128xf32>,
    %c0_97 = arith.constant 0 : index
    %c0_98 = arith.constant 0 : index
    %295 = vector.load %arg12[%c0_97, %c0_98] : memref<8x128xf32, #tpu.memory_space<vmem>>, vector<8x128xf32>
    tpu.vector_store %arg12[%c0_97, %c0_98], %287 {strides = array<i32>} : memref<8x128xf32, #tpu.memory_space<vmem>>, vector<8x128xf32>,
    %c0_i32_99 = arith.constant 0 : i32
    %296 = arith.cmpi eq, %arg1, %c0_i32_99 : i32
    %297 = arith.extui %296 : i1 to i32
    %c0_i32_100 = arith.constant 0 : i32
    %298 = arith.cmpi ne, %297, %c0_i32_100 : i32
    scf.if %298 {
      %c0_101 = arith.constant 0 : index
      %c0_102 = arith.constant 0 : index
      %299 = vector.load %arg9[%c0_101, %c0_102] : memref<8x128xf32, #tpu.memory_space<vmem>>, vector<8x128xf32>
      tpu.vector_store %arg9[%c0_101, %c0_102], %289 {strides = array<i32>} : memref<8x128xf32, #tpu.memory_space<vmem>>, vector<8x128xf32>,
      %c0_103 = arith.constant 0 : index
      %c0_104 = arith.constant 0 : index
      %300 = vector.load %arg10[%c0_103, %c0_104] : memref<8x128xf32, #tpu.memory_space<vmem>>, vector<8x128xf32>
      tpu.vector_store %arg10[%c0_103, %c0_104], %287 {strides = array<i32>} : memref<8x128xf32, #tpu.memory_space<vmem>>, vector<8x128xf32>,
    } else {
    }
    return
  }
  func.func @transform_0(%arg0: i32, %arg1: i32) -> (i32, i32, i32) {
    %c0_i32 = arith.constant 0 : i32
    %c0_i32_0 = arith.constant 0 : i32
    return %arg1, %arg0, %c0_i32 : i32, i32, i32
  }
  func.func @transform_1(%arg0: i32, %arg1: i32) -> (i32, i32) {
    %c0_i32 = arith.constant 0 : i32
    %c0_i32_0 = arith.constant 0 : i32
    return %arg0, %c0_i32 : i32, i32
  }
  func.func @transform_2(%arg0: i32, %arg1: i32) -> (i32, i32) {
    %c0_i32 = arith.constant 0 : i32
    %c0_i32_0 = arith.constant 0 : i32
    return %arg0, %c0_i32 : i32, i32
  }
  func.func @transform_3(%arg0: i32, %arg1: i32) -> (i32, i32) {
    %c0_i32 = arith.constant 0 : i32
    %c0_i32_0 = arith.constant 0 : i32
    %c0_i32_1 = arith.constant 0 : i32
    return %c0_i32, %c0_i32_0 : i32, i32
  }
  func.func @transform_4(%arg0: i32, %arg1: i32) -> (i32, i32) {
    %c0_i32 = arith.constant 0 : i32
    %c0_i32_0 = arith.constant 0 : i32
    %c0_i32_1 = arith.constant 0 : i32
    return %c0_i32, %c0_i32_0 : i32, i32
  }
  func.func @transform_5(%arg0: i32, %arg1: i32) -> (i32, i32) {
    %c0_i32 = arith.constant 0 : i32
    %c0_i32_0 = arith.constant 0 : i32
    %c0_i32_1 = arith.constant 0 : i32
    return %c0_i32, %c0_i32_0 : i32, i32
  }
  func.func @transform_6(%arg0: i32, %arg1: i32) -> (i32, i32, i32) {
    %c0_i32 = arith.constant 0 : i32
    %c0_i32_0 = arith.constant 0 : i32
    return %arg1, %arg0, %c0_i32 : i32, i32, i32
  }
  func.func @transform_7(%arg0: i32, %arg1: i32) -> (i32, i32) {
    %c0_i32 = arith.constant 0 : i32
    %c0_i32_0 = arith.constant 0 : i32
    return %arg0, %c0_i32 : i32, i32
  }
  func.func @transform_8(%arg0: i32, %arg1: i32) -> (i32, i32) {
    %c0_i32 = arith.constant 0 : i32
    %c0_i32_0 = arith.constant 0 : i32
    return %arg0, %c0_i32 : i32, i32
  }
}

</mosaic_0001>

<bundles_post_ra>
// kernel: tpu_custom_call.1
= control target key start
LH: loop header
LB: loop body
LE: loop exit
PB: predicated region body
PF: predicated region fallthrough
CT: control target
= control target key end

     0   :  { %s5214_s0 = inlined_call_operand.hbm [shape: f32[8,16,128], index: 0, kind: input, shape index: {}]   ;;  %s5215_s1 = inlined_call_operand.hbm [shape: f32[16,128], index: 1, kind: input, shape index: {}]   ;;  %s5216_s2 = inlined_call_operand.hbm [shape: f32[16,128], index: 2, kind: input, shape index: {}]   ;;  %s5217_s3 = inlined_call_operand.hbm [shape: f32[128,512], index: 3, kind: input, shape index: {}]   ;;  %s5218_s4 = inlined_call_operand.hbm [shape: f32[128,512], index: 4, kind: input, shape index: {}]   ;;  %s5219_s5 = inlined_call_operand.vmem [shape: f32[1,512], index: 5, kind: input, shape index: {}]   ;;  %s5220_s6 = inlined_call_operand.hbm [shape: f32[8,16,128], index: 6, kind: output, shape index: {0}]   ;;  %s5221_s7 = inlined_call_operand.hbm [shape: f32[16,128], index: 7, kind: output, shape index: {1}]   ;;  %s5222_s8 = inlined_call_operand.hbm [shape: f32[16,128], index: 8, kind: output, shape index: {2}]  }
   0x1   :  { %5247 = sst [smem:[#allocation30_spill]] %s5215_s1 }
   0x2   :  { %5248 = sst [smem:[#allocation31_spill]] %s5217_s3 }
   0x3   :  { %5249 = sst [smem:[#allocation32_spill]] %s5221_s7 }
   0x4   :  { %5250 = sst [smem:[#allocation33_spill]] %s5222_s8 }
   0x5   :  { %14 = vsyncpa [#allocation6], 0 }
   0x6   :  { %16 = vsyncpa [#allocation6 + $0x1], 0 }
   0x7   :  { %17 = vsyncpa [#allocation9], 0 }
   0x8   :  { %19 = vsyncpa [#allocation9 + $0x1], 0 }
   0x9   :  { %20 = vsyncpa [#allocation12], 0 }
   0xa   :  { %21 = vsyncpa [#allocation7], 0 }
   0xb   :  { %23 = vsyncpa [#allocation7 + $0x1], 0 }
   0xc   :  { %24 = vsyncpa [#allocation16], 0 }
   0xd   :  { %26 = vsyncpa [#allocation16 + $0x1], 0  ;;  %s4317_s27 = smov 0   ;;  %s4319_s28 = smov 0  }
   0xe   :  { %s4321_s29 = smov 0   ;;  %s4323_s30 = smov 0  }
   0xf   :  { %s4325_s9 = smov 0   ;;  %s4327_s10 = smov 0  }
  0x10 LB: > { %5251 = sst [smem:[#allocation23_spill]] %s4233_s27  ;;  %s4348_s11 = sadd.s32 4294967295, %s4253_s10   ;;  %s4253_s10 = sphi %s4327_s10, %s32_s10   ;;  %s4249_s9 = sphi %s4325_s9, %s5294_s9   ;;  %s4245_s30 = sphi %s4323_s30, %s5293_s30   ;;  %s4241_s29 = sphi %s4321_s29, %s5292_s29   ;;  %s4237_s28 = sphi %s4319_s28, %s5296_s28   ;;  %s4233_s27 = sphi %s4317_s27, %s5295_s27  }
  0x11   : > { %5252 = sst [smem:[#allocation24_spill]] %s4241_s29  ;;  %s5226_s12 = sadd.s32 4294967294, %s4253_s10  }
  0x12   : > { %5253 = sst [smem:[#allocation25_spill]] %s4249_s9  ;;  %p66_p0 = scmp.ne.s32.totalorder %s4237_s28, %s4233_s27 }
  0x13   : > { %5254 = sst [smem:[#allocation26_spill]] %s4253_s10  ;;  %p5223_p1 = scmp.eq.s32.totalorder %s4348_s11, 0 }
  0x14   : > { %p213_p3 = scmp.eq.s32.totalorder %s5226_s12, 1  ;;  %p3019_p5 = scmp.ge.s32.totalorder %s4253_s10, 1 }
  0x15   : > { %p4359_p4 = por %p5223_p1, %p66_p0  ;;  %p272_p7 = scmp.lt.s32.totalorder %s4253_s10, 3 }
  0x16   : > { %p4364_p6 = por %p213_p3, %p66_p0  ;;  %s4255_s16 = smov [#allocation11]  }
  0x17   : > { %s5255_s13 = scalar_select %p4359_p4, 1, 0 }
  0x18   : > { %s5256_s14 = scalar_select %p4364_p6, 1, 0 }
  0x19   : > { %p4369_p8 = pnand %p3019_p5, %p272_p7  ;;  %s284_s17 = sshll.u32 %s4255_s16, 4  ;;  %s285_s17 = int_to_ptr.vmem [resolvable:$true] %s284_s17 }
  0x1a   : > { %5257 = sst [smem:[#allocation27_spill]] %s5256_s14  ;;  %s44_s19 = sadd.s32 1, %s4249_s9 }
  0x1b   : > { %s5258_s15 = scalar_select %p4369_p8, 1, 0 }
  0x1c   : > { %p3737_p9 = pneg %p4369_p8  ;;  %s5260_s3 = sld [smem:[#allocation31_spill]] }
  0x1e   : > { %p4378_p11 = pnand %p3737_p9, %p5223_p1 }
  0x20   : > { %s5259_s18 = scalar_select %p4378_p11, 1, 0 }
  0x21   : > { %p5237_p13 = pneg %p4378_p11 }
  0x22   : > { %s3957_s22 = scalar_lea.hbm %s5260_s3, 8192 }
  0x23   : > { %p3958_p12 = scmp.ne.s32.totalorder %s5260_s3, %s3957_s22  ;;  %p3964_p5 = scmp.lt.u32.totalorder %s3957_s22, %s5260_s3 }
  0x25   : > { %p3960_p0 = pnand %p5237_p13, %p3958_p12 }
  0x27   : > { %p3961_p3 = pneg %p3960_p0 }
  0x29   : > { %p3966_p7 = pnand %p3964_p5, %p3961_p3 }
  0x2b   : > { %3969 = shalt.err (!%p3966_p7)
}
  0x2c   : > { %s3970_s16 = scalar_lea.vmem %s285_s17, 8192  ;;  %p3978_p2 = scmp.lt.s32.totalorder %s285_s17, %s285_s17 }
  0x2d   : > { %p3971_p9 = scmp.ne.s32.totalorder %s285_s17, %s3970_s16  ;;  %p3979_p6 = scmp.lt.s32.totalorder %s3970_s16, %s3970_s16 }
  0x2f   : > { %p3973_p10 = pnand %p3971_p9, %p5237_p13  ;;  %p3980_p4 = por %p3979_p6, %p3978_p2 }
  0x31   : > { %p3974_p1 = pneg %p3973_p10 }
  0x33   : > { %p3981_p8 = pnand %p3980_p4, %p3974_p1 }
  0x35   : > { %3984 = shalt.err (!%p3981_p8)
}
  0x36   : > { %s5227_s20 = smov 512   ;;  %s5228_s21 = smov 32  }
  0x37   : > { %3740 = dma.hbm_to_vmem [thread:$0]  (!%p4378_p11), %s5260_s3, 8192, %s285_s17, [#allocation12], %s5227_s20, %s5227_s20, %s5228_s21  }
  0x38   : > { %p46_p1 = scmp.ge.s32.totalorder %s44_s19, 2  ;;  %s53_s24 = sadd.s32 1, %s4241_s29 }
  0x39   : > { %p60_p2 = scmp.ne.s32.totalorder %s4241_s29, %s4237_s28  ;;  %p61_p4 = scmp.eq.s32.totalorder %s4253_s10, 0 }
  0x3a   : > { %s5298_s19 = smov (%p46_p1, %s44_s19), 0  ;;  %p5263_p8 = scmp.eq.s32.totalorder %s4348_s11, 1 }
  0x3b   : > { %5261 = sst [smem:[#allocation28_spill]] %s5298_s19  ;;  %p4414_p6 = por %p61_p4, %p60_p2 }
  0x3c   : > { %p4420_p10 = por %p5263_p8, %p60_p2  ;;  %s49_s16 = ssub.s32 %s4249_s9, %s5298_s19 }
  0x3d   : > { %p3766_p12 = scmp.lt.s32.totalorder %s4253_s10, 2  ;;  %p51_p0 = scmp.eq.s32.totalorder %s49_s16, 0 }
  0x3e   : > { %s5264_s26 = scalar_select %p4420_p10, 1, 0 }
  0x3f   : > { %s4428_s17 = sand.u32 1, %s4241_s29   ;;  %s4435_s12 = sshll.u32 %s4249_s9, 7 }
  0x40   : > { %s3023_s22 = sshll.u32 %s4428_s17, 6  ;;  %s4441_s3 = scalar_lea.hbm %s5214_s0, %s4435_s12 }
  0x41   : > { %s4432_s23 = scalar_select %p51_p0, %s4241_s29, %s53_s24  }
  0x42   : > { %s318_s19 = scalar_lea.vmem [#allocation5], %s3023_s22  ;;  %p4447_p3 = pnand %p3766_p12, %p4414_p6 }
  0x43   : > { %5265 = sst [smem:[#allocation29_spill]] %s4432_s23  ;;  %s327_s14 = sshll.u32 %s318_s19, 4  ;;  %s4443_s14 = int_to_ptr.vmem [resolvable:$true] %s327_s14 }
  0x44   : > { %s5266_s16 = scalar_select %p4447_p3, 1, 0 }
  0x45   : > { %s337_s24 = sand.u32 1, %s4253_s10   ;;  %s5234_s9 = sshll.u32 %s4428_s17, 3 }
  0x46   : > { %s5267_s1 = sld [smem:[#allocation30_spill]]  ;;  %s341_s19 = scalar_lea.vmem [#allocation8], %s5234_s9 }
  0x47   : > { %s348_s20 = sshll.u32 %s341_s19, 4  ;;  %s4463_s21 = scalar_lea.sflag [#allocation9], %s337_s24  ;;  %s4461_s20 = int_to_ptr.vmem [resolvable:$true] %s348_s20 }
  0x48   : > { %p4469_p7 = pneg %p4447_p3 }
  0x4a   : > { %s5268_s22 = scalar_select %p4469_p7, 1, 0 }
  0x4c   : > { %s4457_s27 = scalar_lea.hbm %s5267_s1, %s4435_s12  ;;  %s3990_s9 = scalar_lea.hbm %s5267_s1, 256 }
  0x4d   : > { %s3985_s25 = scalar_lea.hbm %s4457_s27, 128  ;;  %p3991_p2 = scmp.lt.u32.totalorder %s4457_s27, %s5267_s1 }
  0x4e   : > { %p3986_p5 = scmp.ne.s32.totalorder %s4457_s27, %s3985_s25  ;;  %p3992_p4 = scmp.lt.u32.totalorder %s3990_s9, %s3985_s25 }
  0x4f   : > { %p3994_p8 = scmp.lt.u32.totalorder %s3985_s25, %s4457_s27 }
  0x50   : > { %p3988_p9 = pnand %p4469_p7, %p3986_p5  ;;  %p3993_p6 = por %p3992_p4, %p3991_p2 }
  0x52   : > { %p3989_p1 = pneg %p3988_p9  ;;  %p3995_p12 = por %p3994_p8, %p3993_p6 }
  0x54   : > { %p3996_p0 = pnand %p3995_p12, %p3989_p1 }
  0x56   : > { %3999 = shalt.err (!%p3996_p0)
}
  0x57   : > { %s4000_s24 = scalar_lea.vmem %s4461_s20, 128  ;;  %s4258_s29 = smov [#allocation8]  }
  0x58   : > { %p4001_p5 = scmp.ne.s32.totalorder %s4461_s20, %s4000_s24  ;;  %s4005_s23 = sshll.u32 %s4258_s29, 4  ;;  %s4006_s23 = int_to_ptr.vmem [resolvable:$false] %s4005_s23 }
  0x59   : > { %s4007_s10 = scalar_lea.vmem %s4006_s23, 256  ;;  %p4008_p10 = scmp.lt.s32.totalorder %s4461_s20, %s4006_s23 }
  0x5a   : > { %p4003_p9 = pnand %p4001_p5, %p4469_p7  ;;  %p4009_p11 = scmp.lt.s32.totalorder %s4007_s10, %s4000_s24 }
  0x5c   : > { %p4004_p13 = pneg %p4003_p9  ;;  %p4010_p2 = por %p4009_p11, %p4008_p10 }
  0x5e   : > { %p4011_p4 = pnand %p4010_p2, %p4004_p13 }
  0x60   : > { %4014 = shalt.err (!%p4011_p4)
}
  0x61   : > { %3750 = dma.hbm_to_vmem [thread:$0]  (!%p4447_p3), %s4457_s27, 128, %s4461_s20, %s4463_s21  }
  0x62   : > { %s4259_s9 = smov [#allocation13]   ;;  %s4015_s29 = scalar_lea.hbm %s5218_s4, 8192 }
  0x63   : > { %s297_s25 = sshll.u32 %s4259_s9, 4  ;;  %p4016_p11 = scmp.ne.s32.totalorder %s5218_s4, %s4015_s29  ;;  %s298_s25 = int_to_ptr.vmem [resolvable:$true] %s297_s25 }
  0x64   : > { %p5269_p13 = scmp.ne.s32.totalorder %s5259_s18, 0  ;;  %p4022_p8 = scmp.lt.u32.totalorder %s4015_s29, %s5218_s4 }
  0x66   : > { %p5270_p10 = pneg %p5269_p13 }
  0x68   : > { %p4018_p1 = pnand %p4016_p11, %p5270_p10 }
  0x6a   : > { %p4019_p6 = pneg %p4018_p1 }
  0x6c   : > { %p4024_p12 = pnand %p4022_p8, %p4019_p6 }
  0x6e   : > { %4027 = shalt.err (!%p4024_p12)
}
  0x6f   : > { %s4028_s27 = scalar_lea.vmem %s298_s25, 8192  ;;  %p5271_p5 = pmov %p5270_p10 }
  0x70   : > { %p4029_p0 = scmp.ne.s32.totalorder %s298_s25, %s4028_s27  ;;  %p4036_p4 = scmp.lt.s32.totalorder %s298_s25, %s298_s25 }
  0x71   : > { %p4037_p3 = scmp.lt.s32.totalorder %s4028_s27, %s4028_s27 }
  0x72   : > { %p4031_p9 = pnand %p4029_p0, %p5271_p5 }
  0x73   : > { %p4038_p7 = por %p4037_p3, %p4036_p4 }
  0x74   : > { %p4032_p2 = pneg %p4031_p9 }
  0x76   : > { %p4039_p10 = pnand %p4038_p7, %p4032_p2 }
  0x78   : > { %4042 = shalt.err (!%p4039_p10)
}
  0x79   : > { %s5272_s1 = smov 32   ;;  %s5273_s8 = smov 512  }
  0x7a   : > { %3743 = dma.hbm_to_vmem [thread:$0]  (!%p5269_p13), %s5218_s4, 8192, %s298_s25, [#allocation12], %s5273_s8, %s5273_s8, %s5272_s1  }
  0x7b   : > { %s4520_s23 = scalar_lea.hbm %s5216_s2, %s4435_s12  ;;  %s315_s18 = scalar_lea.sflag [#allocation6], %s4428_s17 }
  0x7c   : > { %s4043_s24 = scalar_lea.hbm %s4441_s3, 1024  ;;  %p5274_p7 = scmp.ne.s32.totalorder %s5268_s22, 0 }
  0x7d   : > { %p4044_p3 = scmp.ne.s32.totalorder %s4441_s3, %s4043_s24  ;;  %s4048_s20 = scalar_lea.hbm %s5214_s0, 2048 }
  0x7e   : > { %p4049_p6 = scmp.lt.u32.totalorder %s4441_s3, %s5214_s0  ;;  %p4050_p13 = scmp.lt.u32.totalorder %s4048_s20, %s4043_s24 }
  0x7f   : > { %p4046_p11 = pnand %p4044_p3, %p5274_p7  ;;  %p4052_p12 = scmp.lt.u32.totalorder %s4043_s24, %s4441_s3 }
  0x80   : > { %p4051_p8 = por %p4050_p13, %p4049_p6 }
  0x81   : > { %p4047_p1 = pneg %p4046_p11 }
  0x82   : > { %p4053_p0 = por %p4052_p12, %p4051_p8 }
  0x84   : > { %p4054_p5 = pnand %p4053_p0, %p4047_p1 }
  0x86   : > { %4057 = shalt.err (!%p4054_p5)
}
  0x87   : > { %s4058_s12 = scalar_lea.vmem %s4443_s14, 1024  ;;  %s4260_s25 = smov [#allocation5]  }
  0x88   : > { %p4059_p9 = scmp.ne.s32.totalorder %s4443_s14, %s4058_s12  ;;  %s4063_s1 = sshll.u32 %s4260_s25, 4  ;;  %s4064_s1 = int_to_ptr.vmem [resolvable:$false] %s4063_s1 }
  0x89   : > { %s4065_s7 = scalar_lea.vmem %s4064_s1, 2048  ;;  %p4066_p10 = scmp.lt.s32.totalorder %s4443_s14, %s4064_s1 }
  0x8a   : > { %p4061_p2 = pnand %p4059_p9, %p5274_p7  ;;  %p4067_p3 = scmp.lt.s32.totalorder %s4065_s7, %s4058_s12 }
  0x8c   : > { %p4062_p4 = pneg %p4061_p2  ;;  %p4068_p11 = por %p4067_p3, %p4066_p10 }
  0x8e   : > { %p4069_p6 = pnand %p4068_p11, %p4062_p4 }
  0x90   : > { %4072 = shalt.err (!%p4069_p6)
}
  0x91   : > { %s4261_s8 = smov 256   ;;  %s4262_s19 = smov 128  }
  0x92   : > { %s4263_s29 = smov 8   ;;  %p5275_p1 = scmp.ne.s32.totalorder %s5266_s16, 0 }
  0x93   : > { %s5276_s24 = sshll.u32 %s4428_s17, 3  ;;  %s4073_s20 = scalar_lea.hbm %s4520_s23, 128 }
  0x94   : > { %3747 = dma.hbm_to_vmem [thread:$0]  (!%p5275_p1), %s4441_s3, 1024, %s4443_s14, %s315_s18, %s4261_s8, %s4262_s19, %s4263_s29  }
  0x95   : > { %s359_s10 = scalar_lea.vmem [#allocation10], %s5276_s24  ;;  %p4074_p13 = scmp.ne.s32.totalorder %s4520_s23, %s4073_s20 }
  0x96   : > { %s366_s27 = sshll.u32 %s359_s10, 4  ;;  %s4078_s25 = scalar_lea.hbm %s5216_s2, 256  ;;  %s367_s27 = int_to_ptr.vmem [resolvable:$true] %s366_s27 }
  0x97   : > { %p4076_p8 = pnand %p4074_p13, %p5274_p7  ;;  %p4079_p0 = scmp.lt.u32.totalorder %s4520_s23, %s5216_s2 }
  0x98   : > { %p4080_p5 = scmp.lt.u32.totalorder %s4078_s25, %s4073_s20  ;;  %p4082_p2 = scmp.lt.u32.totalorder %s4073_s20, %s4520_s23 }
  0x99   : > { %p4077_p12 = pneg %p4076_p8 }
  0x9a   : > { %p4081_p9 = por %p4080_p5, %p4079_p0 }
  0x9c   : > { %p4083_p4 = por %p4082_p2, %p4081_p9 }
  0x9e   : > { %p4084_p10 = pnand %p4083_p4, %p4077_p12 }
  0xa0   : > { %4087 = shalt.err (!%p4084_p10)
}
  0xa1   : > { %s4088_s3 = scalar_lea.vmem %s367_s27, 128  ;;  %s4264_s14 = smov [#allocation10]  }
  0xa2   : > { %p4089_p3 = scmp.ne.s32.totalorder %s367_s27, %s4088_s3  ;;  %s4093_s17 = sshll.u32 %s4264_s14, 4  ;;  %s4094_s17 = int_to_ptr.vmem [resolvable:$false] %s4093_s17 }
  0xa3   : > { %s4095_s18 = scalar_lea.vmem %s4094_s17, 256  ;;  %p4096_p13 = scmp.lt.s32.totalorder %s367_s27, %s4094_s17 }
  0xa4   : > { %p4091_p11 = pnand %p4089_p3, %p5274_p7  ;;  %p4097_p8 = scmp.lt.s32.totalorder %s4095_s18, %s4088_s3 }
  0xa6   : > { %p4092_p6 = pneg %p4091_p11  ;;  %p4098_p1 = por %p4097_p8, %p4096_p13 }
  0xa8   : > { %p4099_p0 = pnand %p4098_p1, %p4092_p6 }
  0xaa   : > { %4102 = shalt.err (!%p4099_p0)
}
  0xab   : > { %p5277_p5 = scmp.ne.s32.totalorder %s5266_s16, 0  ;;  %p5278_p12 = scmp.ne.s32.totalorder %s5258_s15, 0 }
  0xac   : > { %s4569_s22 = sand.u32 (!%p5278_p12), 1, %s4237_s28   ;;  %p5279_p7 = scmp.ne.s32.totalorder (!%p5278_p12), %s5255_s13, 0 }
  0xad   : > { %3753 = dma.hbm_to_vmem [thread:$0]  (!%p5277_p5), %s4520_s23, 128, %s367_s27, %s4463_s21  }
  0xae   : > { %375 = sbr.rel (%p5278_p12) target bundleno = 2387 (0x953), region = 44  ;;  %s3030_s8 = sshll.u32 (!%p5278_p12), %s4569_s22, 6 }
  0xaf   : > { %s378_s19 = scalar_lea.sflag (!%p5278_p12), [#allocation6], %s4569_s22  ;;  %s4575_s29 = scalar_lea.vmem (!%p5278_p12), [#allocation5], %s3030_s8 }
  0xb5   : > { %4212 = dma.done.wait (%p5279_p7), %s378_s19, 1024  }
  0xb6   : > { %4214 = vsyncadd (%p5279_p7), %s378_s19, 4294966272  ;;  %s386_s15 = sand.u32 1, %s4348_s11   ;;  %s4583_s16 = sshll.u32 %s4569_s22, 3 }
  0xb7   : > { %s387_s21 = scalar_lea.sflag [#allocation9], %s386_s15  ;;  %s390_s23 = scalar_lea.vmem [#allocation8], %s4583_s16 }
  0xb8   : > { %4216 = dma.done.wait (%p5279_p7), %s387_s21, 256  }
  0xb9   : > { %4218 = vsyncadd (%p5279_p7), %s387_s21, 4294967040  ;;  %s399_s24 = scalar_lea.vmem [#allocation10], %s4583_s16  ;;  %p5280_p1 = scmp.eq.s32.totalorder %s4348_s11, 0 }
  0xbb   : > { %4220 = dma.done.wait (%p5280_p1), [#allocation12], 16384   ;;  %p5281_p9 = pmov %p5280_p1 }
  0xbc   : > { %v4265_v0 = vmov 0.0   ;;  %v479_v1 = vld [vmem:[#allocation11 + $0x8] sm:$0xff]  ;;  %v481_v3 = vld [vmem:[#allocation11 + $0x18] sm:$0xff]  ;;  %v478_v6 = vld [vmem:[#allocation11] sm:$0xff]  ;;  %s4779_s27 = scalar_lea.vmem [#allocation14], %s3030_s8  ;;  %s459_s20 = scalar_lea.vmem [#allocation17], %s4583_s16 }
  0xbd   : > { %4222 = vsyncadd (%p5281_p9), [#allocation12], 4294950912  ;;  %628 = vmatprep.mubr.f32.mxu0 %v4265_v0  ;;  %741 = vmatprep.mubr.f32.mxu1 %v4265_v0  ;;  %v483_v2 = vld [vmem:[#allocation11 + $0x28] sm:$0xff]  ;;  %v485_v5 = vld [vmem:[#allocation11 + $0x38] sm:$0xff]  ;;  %s2783_s9 = sshll.u32 %s4779_s27, 4  ;;  %s3072_s12 = sshll.u32 %s4245_s30, 7  ;;  %s5094_s9 = int_to_ptr.vmem [resolvable:$true] %s2783_s9 }
  0xbe   : > { %v3077_v4 = vpack.c.bf16 %v483_v2, %v479_v1  ;;  %v482_v7 = vld [vmem:[#allocation11 + $0x20] sm:$0xff]  ;;  %v3109_v8 = vpack.c.bf16 %v485_v5, %v481_v3  ;;  %v480_v10 = vld [vmem:[#allocation11 + $0x10] sm:$0xff]  ;;  %v487_v12 = vld [vmem:[#allocation11 + $0x48] sm:$0xff]  ;;  %s452_s25 = scalar_lea.vmem [#allocation15], %s4583_s16  ;;  %s5100_s14 = scalar_lea.hbm %s5220_s6, %s3072_s12 }
  0xbf   : > { %v3079_v9 = vpack.c.bf16 %v482_v7, %v478_v6  ;;  %v484_v11 = vld [vmem:[#allocation11 + $0x30] sm:$0xff]  ;;  %v491_v14 = vld [vmem:[#allocation11 + $0x68] sm:$0xff]  ;;  %v489_v15 = vld [vmem:[#allocation11 + $0x58] sm:$0xff]  ;;  %s2799_s1 = sshll.u32 %s452_s25, 4  ;;  %s5282_s8 = sld [smem:[#allocation32_spill]]  ;;  %s5107_s1 = int_to_ptr.vmem [resolvable:$true] %s2799_s1 }
  0xc0   : > { %3078 = vmatprep.subr.bf16.mxu0 %v3077_v4  ;;  %v3111_v13 = vpack.c.bf16 %v484_v11, %v480_v10  ;;  %v493_v16 = vld [vmem:[#allocation11 + $0x78] sm:$0xff]  ;;  %3110 = vmatprep.subr.bf16.mxu1 %v3109_v8  ;;  %v3081_v17 = vpack.c.bf16 %v491_v14, %v487_v12  ;;  %v486_v19 = vld [vmem:[#allocation11 + $0x40] sm:$0xff]  ;;  %v488_v21 = vld [vmem:[#allocation11 + $0x50] sm:$0xff]  ;;  %s5283_s21 = sld [smem:[#allocation33_spill]]  ;;  %s4103_s13 = scalar_lea.vmem %s5107_s1, 128 }
  0xc1   : > { %3080 = vmatpush1.bf16.msra.mxu0 %v3079_v9  ;;  %v3113_v18 = vpack.c.bf16 %v493_v16, %v489_v15  ;;  %v490_v20 = vld [vmem:[#allocation11 + $0x60] sm:$0xff]  ;;  %v492_v23 = vld [vmem:[#allocation11 + $0x70] sm:$0xff]  ;;  %v495_v24 = vld [vmem:[#allocation11 + $0x88] sm:$0xff]  ;;  %p4104_p2 = scmp.ne.s32.totalorder %s5107_s1, %s4103_s13  ;;  %p5284_p4 = scmp.ne.s32.totalorder %s5264_s26, 0 }
  0xc2   : > { %3112 = vmatpush1.bf16.msra.mxu1 %v3111_v13  ;;  %v3083_v22 = vpack.c.bf16 %v490_v20, %v486_v19  ;;  %v499_v25 = vld [vmem:[#allocation11 + $0xa8] sm:$0xff]  ;;  %3082 = vmatprep.subr.bf16.mxu0 %v3081_v17  ;;  %v3115_v26 = vpack.c.bf16 %v492_v23, %v488_v21  ;;  %v497_v28 = vld [vmem:[#allocation11 + $0x98] sm:$0xff]  ;;  %v494_v30 = vld [vmem:[#allocation11 + $0x80] sm:$0xff]  ;;  %s4266_s10 = smov [#allocation15]  }
  0xc3   : > { %3114 = vmatprep.subr.bf16.mxu1 %v3113_v18  ;;  %v3085_v27 = vpack.c.bf16 %v499_v25, %v495_v24  ;;  %v501_v29 = vld [vmem:[#allocation11 + $0xb8] sm:$0xff]  ;;  %v498_v32 = vld [vmem:[#allocation11 + $0xa0] sm:$0xff]  ;;  %v496_v33 = vld [vmem:[#allocation11 + $0x90] sm:$0xff]  ;;  %p4105_p10 = pnand %p4104_p2, %p5284_p4 }
  0xc4   : > { %v3117_v31 = vpack.c.bf16 %v501_v29, %v497_v28  ;;  %v500_v34 = vld [vmem:[#allocation11 + $0xb0] sm:$0xff]  ;;  %v3087_v35 = vpack.c.bf16 %v498_v32, %v494_v30  ;;  %v503_v36 = vld [vmem:[#allocation11 + $0xc8] sm:$0xff]  ;;  %v505_v38 = vld [vmem:[#allocation11 + $0xd8] sm:$0xff] }
  0xc5   : > { %3084 = vmatpush1.bf16.msra.mxu0 %v3083_v22  ;;  %v507_v37 = vld [vmem:[#allocation11 + $0xe8] sm:$0xff]  ;;  %v3119_v39 = vpack.c.bf16 %v500_v34, %v496_v33  ;;  %v509_v41 = vld [vmem:[#allocation11 + $0xf8] sm:$0xff]  ;;  %v502_v42 = vld [vmem:[#allocation11 + $0xc0] sm:$0xff]  ;;  %s5105_s19 = scalar_lea.hbm %s5282_s8, %s3072_s12  ;;  %p4106_p3 = pneg %p4105_p10 }
  0xc6   : > { %3116 = vmatpush1.bf16.msra.mxu1 %v3115_v26  ;;  %3086 = vmatprep.subr.bf16.mxu0 %v3085_v27  ;;  %v3089_v40 = vpack.c.bf16 %v507_v37, %v503_v36  ;;  %v506_v43 = vld [vmem:[#allocation11 + $0xe0] sm:$0xff]  ;;  %v3121_v44 = vpack.c.bf16 %v509_v41, %v505_v38  ;;  %v504_v45 = vld [vmem:[#allocation11 + $0xd0] sm:$0xff]  ;;  %v511_v47 = vld [vmem:[#allocation11 + $0x108] sm:$0xff] }
  0xc7   : > { %3118 = vmatprep.subr.bf16.mxu1 %v3117_v31  ;;  %v508_v46 = vld [vmem:[#allocation11 + $0xf0] sm:$0xff]  ;;  %v515_v48 = vld [vmem:[#allocation11 + $0x128] sm:$0xff]  ;;  %v513_v49 = vld [vmem:[#allocation11 + $0x118] sm:$0xff]  ;;  %v3091_v51 = vpack.c.bf16 %v506_v43, %v502_v42 }
  0xc8   : > { %v517_v50 = vld [vmem:[#allocation11 + $0x138] sm:$0xff]  ;;  %v3123_v52 = vpack.c.bf16 %v508_v46, %v504_v45  ;;  %v3093_v53 = vpack.c.bf16 %v515_v48, %v511_v47  ;;  %v510_v54 = vld [vmem:[#allocation11 + $0x100] sm:$0xff]  ;;  %v512_v56 = vld [vmem:[#allocation11 + $0x110] sm:$0xff] }
  0xc9   : > { %3088 = vmatpush1.bf16.msra.mxu0 %v3087_v35  ;;  %v514_v55 = vld [vmem:[#allocation11 + $0x120] sm:$0xff]  ;;  %v3125_v57 = vpack.c.bf16 %v517_v50, %v513_v49  ;;  %v516_v58 = vld [vmem:[#allocation11 + $0x130] sm:$0xff]  ;;  %v519_v59 = vld [vmem:[#allocation11 + $0x148] sm:$0xff] }
  0xca   : > { %3120 = vmatpush1.bf16.msra.mxu1 %v3119_v39  ;;  %3090 = vmatprep.subr.bf16.mxu0 %v3089_v40  ;;  %v523_v60 = vld [vmem:[#allocation11 + $0x168] sm:$0xff]  ;;  %v521_v61 = vld [vmem:[#allocation11 + $0x158] sm:$0xff]  ;;  %v3095_v63 = vpack.c.bf16 %v514_v55, %v510_v54  ;;  %v3127_v1 = vpack.c.bf16 %v516_v58, %v512_v56  ;;  %v518_v3 = vld [vmem:[#allocation11 + $0x140] sm:$0xff] }
  0xcb   : > { %3122 = vmatprep.subr.bf16.mxu1 %v3121_v44  ;;  %v525_v62 = vld [vmem:[#allocation11 + $0x178] sm:$0xff]  ;;  %v3097_v2 = vpack.c.bf16 %v523_v60, %v519_v59  ;;  %v522_v4 = vld [vmem:[#allocation11 + $0x160] sm:$0xff]  ;;  %v520_v5 = vld [vmem:[#allocation11 + $0x150] sm:$0xff] }
  0xcc   : > { %v3129_v6 = vpack.c.bf16 %v525_v62, %v521_v61  ;;  %v524_v7 = vld [vmem:[#allocation11 + $0x170] sm:$0xff]  ;;  %v527_v8 = vld [vmem:[#allocation11 + $0x188] sm:$0xff]  ;;  %v529_v10 = vld [vmem:[#allocation11 + $0x198] sm:$0xff]  ;;  %v3099_v12 = vpack.c.bf16 %v522_v4, %v518_v3 }
  0xcd   : > { %3092 = vmatpush1.bf16.msra.mxu0 %v3091_v51  ;;  %v531_v9 = vld [vmem:[#allocation11 + $0x1a8] sm:$0xff]  ;;  %v533_v11 = vld [vmem:[#allocation11 + $0x1b8] sm:$0xff]  ;;  %v3131_v13 = vpack.c.bf16 %v524_v7, %v520_v5  ;;  %v526_v15 = vld [vmem:[#allocation11 + $0x180] sm:$0xff] }
  0xce   : > { %3124 = vmatpush1.bf16.msra.mxu1 %v3123_v52  ;;  %3094 = vmatprep.subr.bf16.mxu0 %v3093_v53  ;;  %v3101_v14 = vpack.c.bf16 %v531_v9, %v527_v8  ;;  %v530_v16 = vld [vmem:[#allocation11 + $0x1a0] sm:$0xff]  ;;  %v528_v17 = vld [vmem:[#allocation11 + $0x190] sm:$0xff]  ;;  %v3133_v18 = vpack.c.bf16 %v533_v11, %v529_v10  ;;  %v535_v20 = vld [vmem:[#allocation11 + $0x1c8] sm:$0xff] }
  0xcf   : > { %3126 = vmatprep.subr.bf16.mxu1 %v3125_v57  ;;  %v532_v19 = vld [vmem:[#allocation11 + $0x1b0] sm:$0xff]  ;;  %v539_v21 = vld [vmem:[#allocation11 + $0x1e8] sm:$0xff]  ;;  %v537_v22 = vld [vmem:[#allocation11 + $0x1d8] sm:$0xff]  ;;  %v3103_v24 = vpack.c.bf16 %v530_v16, %v526_v15 }
  0xd0   : > { %v541_v23 = vld [vmem:[#allocation11 + $0x1f8] sm:$0xff]  ;;  %v3135_v25 = vpack.c.bf16 %v532_v19, %v528_v17  ;;  %v3105_v26 = vpack.c.bf16 %v539_v21, %v535_v20  ;;  %v534_v27 = vld [vmem:[#allocation11 + $0x1c0] sm:$0xff]  ;;  %v536_v29 = vld [vmem:[#allocation11 + $0x1d0] sm:$0xff] }
  0xd1   : > { %3096 = vmatpush1.bf16.msra.mxu0 %v3095_v63  ;;  %v538_v28 = vld [vmem:[#allocation11 + $0x1e0] sm:$0xff]  ;;  %v3137_v30 = vpack.c.bf16 %v541_v23, %v537_v22  ;;  %v540_v31 = vld [vmem:[#allocation11 + $0x1f0] sm:$0xff]  ;;  %v829_v32 = vld [vmem:[#allocation13 + $0x8] sm:$0xff] }
  0xd2   : > { %3128 = vmatpush1.bf16.msra.mxu1 %v3127_v1  ;;  %3098 = vmatprep.subr.bf16.mxu0 %v3097_v2  ;;  %v833_v33 = vld [vmem:[#allocation13 + $0x28] sm:$0xff]  ;;  %v831_v34 = vld [vmem:[#allocation13 + $0x18] sm:$0xff]  ;;  %v3107_v36 = vpack.c.bf16 %v538_v28, %v534_v27  ;;  %v3139_v37 = vpack.c.bf16 %v540_v31, %v536_v29  ;;  %v828_v39 = vld [vmem:[#allocation13] sm:$0xff] }
  0xd3   : > { %3130 = vmatprep.subr.bf16.mxu1 %v3129_v6  ;;  %v835_v35 = vld [vmem:[#allocation13 + $0x38] sm:$0xff]  ;;  %v4599_v38 = vpack.c.bf16 %v833_v33, %v829_v32  ;;  %v832_v40 = vld [vmem:[#allocation13 + $0x20] sm:$0xff]  ;;  %v830_v42 = vld [vmem:[#allocation13 + $0x10] sm:$0xff] }
  0xd4   : > { %v4601_v41 = vpack.c.bf16 %v835_v35, %v831_v34  ;;  %v834_v43 = vld [vmem:[#allocation13 + $0x30] sm:$0xff]  ;;  %v837_v44 = vld [vmem:[#allocation13 + $0x48] sm:$0xff]  ;;  %v470_v46 = vld [vmem:[%s4575_s29] sm:$0xff]  ;;  %v4604_v47 = vpack.c.bf16 %v832_v40, %v828_v39 }
  0xd5   : > { %3100 = vmatpush1.bf16.msra.mxu0 %v3099_v12  ;;  %v841_v45 = vld [vmem:[#allocation13 + $0x68] sm:$0xff]  ;;  %v839_v48 = vld [vmem:[#allocation13 + $0x58] sm:$0xff]  ;;  %v4607_v50 = vpack.c.bf16 %v834_v43, %v830_v42  ;;  %v836_v51 = vld [vmem:[#allocation13 + $0x40] sm:$0xff] }
  0xd6   : > { %3132 = vmatpush1.bf16.msra.mxu1 %v3131_v13  ;;  %3102 = vmatprep.subr.bf16.mxu0 %v3101_v14  ;;  %v843_v49 = vld [vmem:[#allocation13 + $0x78] sm:$0xff]  ;;  %v840_v52 = vld [vmem:[#allocation13 + $0x60] sm:$0xff]  ;;  %v4610_v53 = vpack.c.bf16 %v841_v45, %v837_v44  ;;  %v838_v54 = vld [vmem:[#allocation13 + $0x50] sm:$0xff] }
  0xd7   : > { %3134 = vmatprep.subr.bf16.mxu1 %v3133_v18  ;;  %v842_v55 = vld [vmem:[#allocation13 + $0x70] sm:$0xff]  ;;  %v4612_v56 = vpack.c.bf16 %v843_v49, %v839_v48  ;;  %v845_v57 = vld [vmem:[#allocation13 + $0x88] sm:$0xff]  ;;  %v4616_v60 = vpack.c.bf16 %v840_v52, %v836_v51  ;;  %v847_v61 = vld [vmem:[#allocation13 + $0x98] sm:$0xff] }
  0xd8   : > { %v849_v58 = vld [vmem:[#allocation13 + $0xa8] sm:$0xff]  ;;  %v851_v62 = vld [vmem:[#allocation13 + $0xb8] sm:$0xff]  ;;  %v4620_v63 = vpack.c.bf16 %v842_v55, %v838_v54  ;;  %v844_v1 = vld [vmem:[#allocation13 + $0x80] sm:$0xff] }
  0xd9   : > { %3104 = vmatpush1.bf16.msra.mxu0 %v3103_v24  ;;  %v471_v59 = vld [vmem:[%s4575_s29 + $0x8] sm:$0xff]  ;;  %v848_v2 = vld [vmem:[#allocation13 + $0xa0] sm:$0xff]  ;;  %v4624_v3 = vpack.c.bf16 %v849_v58, %v845_v57  ;;  %v846_v4 = vld [vmem:[#allocation13 + $0x90] sm:$0xff]  ;;  %v4627_v6 = vpack.c.bf16 %v851_v62, %v847_v61 }
  0xda   : > { %3136 = vmatpush1.bf16.msra.mxu1 %v3135_v25  ;;  %3106 = vmatprep.subr.bf16.mxu0 %v3105_v26  ;;  %v850_v5 = vld [vmem:[#allocation13 + $0xb0] sm:$0xff]  ;;  %v853_v7 = vld [vmem:[#allocation13 + $0xc8] sm:$0xff]  ;;  %v4631_v10 = vpack.c.bf16 %v848_v2, %v844_v1  ;;  %v855_v11 = vld [vmem:[#allocation13 + $0xd8] sm:$0xff] }
  0xdb   : > { %3138 = vmatprep.subr.bf16.mxu1 %v3137_v30  ;;  %v857_v8 = vld [vmem:[#allocation13 + $0xe8] sm:$0xff]  ;;  %v472_v9 = vld [vmem:[%s4575_s29 + $0x10] sm:$0xff]  ;;  %v859_v12 = vld [vmem:[#allocation13 + $0xf8] sm:$0xff]  ;;  %v4635_v13 = vpack.c.bf16 %v850_v5, %v846_v4 }
  0xdc   : > { %v852_v14 = vld [vmem:[#allocation13 + $0xc0] sm:$0xff]  ;;  %v4639_v16 = vpack.c.bf16 %v857_v8, %v853_v7  ;;  %v854_v17 = vld [vmem:[#allocation13 + $0xd0] sm:$0xff]  ;;  %v4642_v19 = vpack.c.bf16 %v859_v12, %v855_v11  ;;  %v861_v20 = vld [vmem:[#allocation13 + $0x108] sm:$0xff] }
  0xdd   : > { %3108 = vmatpush1.bf16.msra.mxu0 %v3107_v36  ;;  %v856_v15 = vld [vmem:[#allocation13 + $0xe0] sm:$0xff]  ;;  %v858_v18 = vld [vmem:[#allocation13 + $0xf0] sm:$0xff]  ;;  %v865_v21 = vld [vmem:[#allocation13 + $0x128] sm:$0xff] }
  0xde   : > { %3140 = vmatpush1.bf16.msra.mxu1 %v3139_v37  ;;  %3142 = vmatprep.subr.bf16.mxu0 %v4599_v38  ;;  %v473_v22 = vld [vmem:[%s4575_s29 + $0x18] sm:$0xff]  ;;  %v4646_v23 = vpack.c.bf16 %v856_v15, %v852_v14  ;;  %v4650_v26 = vpack.c.bf16 %v858_v18, %v854_v17  ;;  %v860_v27 = vld [vmem:[#allocation13 + $0x100] sm:$0xff]  ;;  %v4654_v29 = vpack.c.bf16 %v865_v21, %v861_v20  ;;  %v862_v30 = vld [vmem:[#allocation13 + $0x110] sm:$0xff] }
  0xdf   : > { %3174 = vmatprep.subr.bf16.mxu1 %v4601_v41  ;;  %v863_v24 = vld [vmem:[#allocation13 + $0x118] sm:$0xff]  ;;  %v864_v28 = vld [vmem:[#allocation13 + $0x120] sm:$0xff]  ;;  %v866_v31 = vld [vmem:[#allocation13 + $0x130] sm:$0xff] }
  0xe0   : > { %629 = vmatmul.mubr.f32.vlgmr.msra.gmra.mrb[0].mxu0 %v470_v46  ;;  %v867_v25 = vld [vmem:[#allocation13 + $0x138] sm:$0xff]  ;;  %v869_v33 = vld [vmem:[#allocation13 + $0x148] sm:$0xff]  ;;  %v474_v35 = vld [vmem:[%s4575_s29 + $0x20] sm:$0xff]  ;;  %v4661_v36 = vpack.c.bf16 %v864_v28, %v860_v27  ;;  %v4665_v40 = vpack.c.bf16 %v866_v31, %v862_v30  ;;  %v544_v30 = vlaneseq }
  0xe1   : > { %742 = vmatmul.mubr.f32.vlgmr.msra.gmra.mrb[0].mxu1 %v470_v46  ;;  %3144 = vmatpush1.bf16.msra.mxu0 %v4604_v47  ;;  %v4657_v32 = vpack.c.bf16 %v867_v25, %v863_v24  ;;  %v873_v34 = vld [vmem:[#allocation13 + $0x168] sm:$0xff]  ;;  %v871_v37 = vld [vmem:[#allocation13 + $0x158] sm:$0xff]  ;;  %v868_v42 = vld [vmem:[#allocation13 + $0x140] sm:$0xff] }
  0xe2   : > { %3176 = vmatpush1.bf16.msra.mxu1 %v4607_v50  ;;  %634 = vmatprep.mubr.f32.mxu0 %v4265_v0  ;;  %v875_v39 = vld [vmem:[#allocation13 + $0x178] sm:$0xff]  ;;  %v872_v43 = vld [vmem:[#allocation13 + $0x160] sm:$0xff]  ;;  %v4669_v44 = vpack.c.bf16 %v873_v34, %v869_v33  ;;  %v870_v45 = vld [vmem:[#allocation13 + $0x150] sm:$0xff]  ;;  %v545_v31 = vshrl.u32 %v544_v30, 7 }
  0xe3   : > { %747 = vmatprep.mubr.f32.mxu1 %v4265_v0  ;;  %3146 = vmatprep.subr.bf16.mxu0 %v4610_v53  ;;  %v874_v46 = vld [vmem:[#allocation13 + $0x170] sm:$0xff]  ;;  %v4672_v48 = vpack.c.bf16 %v875_v39, %v871_v37  ;;  %v877_v49 = vld [vmem:[#allocation13 + $0x188] sm:$0xff]  ;;  %v4676_v54 = vpack.c.bf16 %v872_v43, %v868_v42  ;;  %v879_v55 = vld [vmem:[#allocation13 + $0x198] sm:$0xff] }
  0xe4   : > { %635 = vmatmul.mubr.f32.gmra.mrb[2].mxu0 %v471_v59  ;;  %3178 = vmatprep.subr.bf16.mxu1 %v4612_v56  ;;  %v881_v51 = vld [vmem:[#allocation13 + $0x1a8] sm:$0xff]  ;;  %v883_v57 = vld [vmem:[#allocation13 + $0x1b8] sm:$0xff]  ;;  %v4680_v58 = vpack.c.bf16 %v874_v46, %v870_v45  ;;  %v880_v61 = vld [vmem:[#allocation13 + $0x1a0] sm:$0xff]  ;;  %v546_v33 = vsub.s32 0, %v545_v31  ;;  %v558_v43 = vsub.s32 3, %v545_v31 }
  0xe5   : > { %748 = vmatmul.mubr.f32.gmra.mrb[2].mxu1 %v471_v59  ;;  %3148 = vmatpush1.bf16.msra.mxu0 %v4616_v60  ;;  %v475_v52 = vld [vmem:[%s4575_s29 + $0x28] sm:$0xff]  ;;  %v876_v59 = vld [vmem:[#allocation13 + $0x180] sm:$0xff]  ;;  %v4684_v62 = vpack.c.bf16 %v881_v51, %v877_v49  ;;  %v878_v1 = vld [vmem:[#allocation13 + $0x190] sm:$0xff]  ;;  %v4687_v4 = vpack.c.bf16 %v883_v57, %v879_v55  ;;  %v554_v57 = vsub.s32 2, %v545_v31 }
  0xe6   : > { %3180 = vmatpush1.bf16.msra.mxu1 %v4620_v63  ;;  %640 = vmatprep.mubr.f32.mxu0 %v4265_v0  ;;  %v882_v2 = vld [vmem:[#allocation13 + $0x1b0] sm:$0xff]  ;;  %v885_v5 = vld [vmem:[#allocation13 + $0x1c8] sm:$0xff]  ;;  %v887_v11 = vld [vmem:[#allocation13 + $0x1d8] sm:$0xff] }
  0xe7   : > { %753 = vmatprep.mubr.f32.mxu1 %v4265_v0  ;;  %3150 = vmatprep.subr.bf16.mxu0 %v4624_v3  ;;  %v889_v7 = vld [vmem:[#allocation13 + $0x1e8] sm:$0xff]  ;;  %v476_v8 = vld [vmem:[%s4575_s29 + $0x30] sm:$0xff]  ;;  %v891_v12 = vld [vmem:[#allocation13 + $0x1f8] sm:$0xff]  ;;  %v4695_v14 = vpack.c.bf16 %v882_v2, %v878_v1 }
  0xe8   : > { %641 = vmatmul.mubr.f32.gmra.mrb[4].mxu0 %v472_v9  ;;  %3182 = vmatprep.subr.bf16.mxu1 %v4627_v6  ;;  %v884_v15 = vld [vmem:[#allocation13 + $0x1c0] sm:$0xff]  ;;  %v4699_v18 = vpack.c.bf16 %v889_v7, %v885_v5  ;;  %v886_v20 = vld [vmem:[#allocation13 + $0x1d0] sm:$0xff]  ;;  %v477_v24 = vld [vmem:[%s4575_s29 + $0x38] sm:$0xff]  ;;  %s2812_s29 = sshll.u32 %s459_s20, 4  ;;  %s5115_s29 = int_to_ptr.vmem [resolvable:$true] %s2812_s29 }
  0xe9   : > { %754 = vmatmul.mubr.f32.gmra.mrb[4].mxu1 %v472_v9  ;;  %3152 = vmatpush1.bf16.msra.mxu0 %v4631_v10  ;;  %v4691_v9 = vpack.c.bf16 %v880_v61, %v876_v59  ;;  %v888_v17 = vld [vmem:[#allocation13 + $0x1e0] sm:$0xff]  ;;  %v890_v21 = vld [vmem:[#allocation13 + $0x1f0] sm:$0xff] }
  0xea   : > { %3184 = vmatpush1.bf16.msra.mxu1 %v4635_v13  ;;  %646 = vmatprep.mubr.f32.mxu0 %v4265_v0  ;;  %v4706_v25 = vpack.c.bf16 %v888_v17, %v884_v15  ;;  %v4710_v27 = vpack.c.bf16 %v890_v21, %v886_v20  ;;  %v466_v28 = vld [vmem:[%s390_s23] sm:$0xff]  ;;  %v468_v17 = vld [vmem:[%s399_s24] sm:$0xff]  ;;  %s5113_s23 = scalar_lea.hbm %s5283_s21, %s3072_s12  ;;  %s5119_s24 = scalar_lea.sflag [#allocation16], %s386_s15 }
  0xeb   : > { %759 = vmatprep.mubr.f32.mxu1 %v4265_v0  ;;  %3154 = vmatprep.subr.bf16.mxu0 %v4639_v16  ;;  %v542_v34 = vld [vmem:[%s5219_s5] sm:$0xf] }
  0xec   : > { %647 = vmatmul.mubr.f32.gmra.mrb[6].mxu0 %v473_v22  ;;  %3186 = vmatprep.subr.bf16.mxu1 %v4642_v19  ;;  %v4760_v37 = vrot.slane %v542_v34, %v546_v33  ;;  %v4766_v55 = vrot.slane %v542_v34, %v558_v43  ;;  %v4769_v61 = vrot.slane %v542_v34, %v554_v57 }
  0xed   : > { %760 = vmatmul.mubr.f32.gmra.mrb[6].mxu1 %v473_v22  ;;  %3156 = vmatpush1.bf16.msra.mxu0 %v4646_v23  ;;  %v4702_v22 = vpack.c.bf16 %v891_v12, %v887_v11 }
  0xee   : > { %3188 = vmatpush1.bf16.msra.mxu1 %v4650_v26  ;;  %652 = vmatprep.mubr.f32.mxu0 %v4265_v0 }
  0xef   : > { %765 = vmatprep.mubr.f32.mxu1 %v4265_v0  ;;  %3158 = vmatprep.subr.bf16.mxu0 %v4654_v29 }
  0xf0   : > { %653 = vmatmul.mubr.f32.gmra.mrb[8].mxu0 %v474_v35  ;;  %3190 = vmatprep.subr.bf16.mxu1 %v4657_v32 }
  0xf1   : > { %766 = vmatmul.mubr.f32.gmra.mrb[8].mxu1 %v474_v35  ;;  %3160 = vmatpush1.bf16.msra.mxu0 %v4661_v36  ;;  %v550_v35 = vsub.s32 1, %v545_v31 }
  0xf2   : > { %3192 = vmatpush1.bf16.msra.mxu1 %v4665_v40  ;;  %658 = vmatprep.mubr.f32.mxu0 %v4265_v0 }
  0xf3   : > { %771 = vmatprep.mubr.f32.mxu1 %v4265_v0  ;;  %3162 = vmatprep.subr.bf16.mxu0 %v4669_v44  ;;  %v4762_v39 = vrot.slane %v542_v34, %v550_v35 }
  0xf4   : > { %659 = vmatmul.mubr.f32.gmra.mrb[10].mxu0 %v475_v52  ;;  %3194 = vmatprep.subr.bf16.mxu1 %v4672_v48 }
  0xf5   : > { %772 = vmatmul.mubr.f32.gmra.mrb[10].mxu1 %v475_v52  ;;  %3164 = vmatpush1.bf16.msra.mxu0 %v4676_v54 }
  0xf6   : > { %3196 = vmatpush1.bf16.msra.mxu1 %v4680_v58  ;;  %664 = vmatprep.mubr.f32.mxu0 %v4265_v0 }
  0xf7   : > { %777 = vmatprep.mubr.f32.mxu1 %v4265_v0  ;;  %3166 = vmatprep.subr.bf16.mxu0 %v4684_v62 }
  0xf8   : > { %665 = vmatmul.mubr.f32.gmra.mrb[12].mxu0 %v476_v8  ;;  %3198 = vmatprep.subr.bf16.mxu1 %v4687_v4 }
  0xf9   : > { %778 = vmatmul.mubr.f32.gmra.mrb[12].mxu1 %v476_v8  ;;  %3168 = vmatpush1.bf16.msra.mxu0 %v4691_v9 }
  0xfa   : > { %3200 = vmatpush1.bf16.msra.mxu1 %v4695_v14  ;;  %670 = vmatprep.mubr.f32.mxu0 %v4265_v0 }
  0xfb   : > { %783 = vmatprep.mubr.f32.mxu1 %v4265_v0  ;;  %3170 = vmatprep.subr.bf16.mxu0 %v4699_v18 }
  0xfc   : > { %671 = vmatmul.mubr.f32.gmra.mrb[14].mxu0 %v477_v24  ;;  %3202 = vmatprep.subr.bf16.mxu1 %v4702_v22 }
  0xfd   : > { %784 = vmatmul.mubr.f32.gmra.mrb[14].mxu1 %v477_v24  ;;  %3172 = vmatpush1.bf16.msra.mxu0 %v4706_v25 }
  0xfe   : > { %3204 = vmatpush1.bf16.msra.mxu1 %v4710_v27  ;;  %956 = vmatprep.mubr.f32.mxu0 %v4265_v0 }
  0xff   : > { %1027 = vmatprep.mubr.f32.mxu1 %v4265_v0  ;;  %3206 = vmatprep.subr.bf16.mxu0 %v4599_v38 }
 0x100   : > { %957 = vmatmul.mubr.f32.vlgmr.msra.gmra.mrb[0].mxu0 %v466_v28  ;;  %3238 = vmatprep.subr.bf16.mxu1 %v4601_v41 }
 0x101   : > { %1028 = vmatmul.mubr.f32.vlgmr.msra.gmra.mrb[0].mxu1 %v466_v28  ;;  %3208 = vmatpush1.bf16.msra.mxu0 %v4604_v47 }
 0x102   : > { %3240 = vmatpush1.bf16.msra.mxu1 %v4607_v50  ;;  %3210 = vmatprep.subr.bf16.mxu0 %v4610_v53 }
 0x103   : > { %3242 = vmatprep.subr.bf16.mxu1 %v4612_v56  ;;  %1196 = vmatprep.mubr.f32.mxu0 %v4265_v0 }
 0x104   : > { %1267 = vmatprep.mubr.f32.mxu1 %v4265_v0 }
 0x105   : > { %3212 = vmatpush1.bf16.msra.mxu0 %v4616_v60 }
 0x106   : > { %3244 = vmatpush1.bf16.msra.mxu1 %v4620_v63  ;;  %3214 = vmatprep.subr.bf16.mxu0 %v4624_v3 }
 0x107   : > { %3246 = vmatprep.subr.bf16.mxu1 %v4627_v6 }
 0x109   : > { %3216 = vmatpush1.bf16.msra.mxu0 %v4631_v10 }
 0x10a   : > { %3248 = vmatpush1.bf16.msra.mxu1 %v4635_v13  ;;  %3218 = vmatprep.subr.bf16.mxu0 %v4639_v16 }
 0x10b   : > { %3250 = vmatprep.subr.bf16.mxu1 %v4642_v19 }
 0x10d   : > { %3220 = vmatpush1.bf16.msra.mxu0 %v4646_v23 }
 0x10e   : > { %3252 = vmatpush1.bf16.msra.mxu1 %v4650_v26  ;;  %3222 = vmatprep.subr.bf16.mxu0 %v4654_v29 }
 0x10f   : > { %3254 = vmatprep.subr.bf16.mxu1 %v4657_v32 }
 0x111   : > { %3224 = vmatpush1.bf16.msra.mxu0 %v4661_v36 }
 0x112   : > { %3256 = vmatpush1.bf16.msra.mxu1 %v4665_v40  ;;  %3226 = vmatprep.subr.bf16.mxu0 %v4669_v44 }
 0x113   : > { %3258 = vmatprep.subr.bf16.mxu1 %v4672_v48 }
 0x115   : > { %3228 = vmatpush1.bf16.msra.mxu0 %v4676_v54 }
 0x116   : > { %3260 = vmatpush1.bf16.msra.mxu1 %v4680_v58  ;;  %3230 = vmatprep.subr.bf16.mxu0 %v4684_v62 }
 0x117   : > { %3262 = vmatprep.subr.bf16.mxu1 %v4687_v4 }
 0x119   : > { %3232 = vmatpush1.bf16.msra.mxu0 %v4691_v9 }
 0x11a   : > { %3264 = vmatpush1.bf16.msra.mxu1 %v4695_v14  ;;  %3234 = vmatprep.subr.bf16.mxu0 %v4699_v18 }
 0x11b   : > { %3266 = vmatprep.subr.bf16.mxu1 %v4702_v22 }
 0x11d   : > { %3236 = vmatpush1.bf16.msra.mxu0 %v4706_v25 }
 0x11e   : > { %3268 = vmatpush1.bf16.msra.mxu1 %v4710_v27  ;;  %3270 = vmatprep.subr.bf16.mxu0 %v4599_v38 }
 0x11f   : > { %3302 = vmatprep.subr.bf16.mxu1 %v4601_v41 }
 0x1d3   : > { %v958_v42 = vpop.f32.mrb[0].mxu0 }
 0x1d4   : > { %v3653_v45 = vadd.f32 %v958_v42, %v4760_v37  ;;  %v1029_v46 = vpop.f32.mrb[0].mxu1  ;;  %v960_v38 = vpop.f32.mrb[1].mxu0 }
 0x1d5   : > { %v3654_v41 = vadd.f32 %v960_v38, %v4762_v39  ;;  %v1031_v49 = vpop.f32.mrb[1].mxu1  ;;  %v3669_v2 = vadd.f32 %v1029_v46, %v4769_v61 }
 0x1d6   : > { %v3038_v51 = vmul.f32 -1.442695, %v3653_v45  ;;  %v3670_v59 = vadd.f32 %v1031_v49, %v4766_v55 }
 0x1d7   : > { %v3039_v52 = vmul.f32 -1.442695, %v3654_v41 }
 0x1d8   : > { %3829 = vpow2.f32 %v3038_v51  ;;  %v3040_v1 = vmul.f32 -1.442695, %v3670_v59 }
 0x1d9   : > { %3831 = vpow2.f32 %v3039_v52 }
 0x1da   : > { %3833 = vpow2.f32 %v3040_v1 }
 0x1db   : > { %3835 = vtanh.f32 %v3669_v2 }
 0x1e2   : > { %v3830_v5 = vpop.eup %3829 }
 0x1e3   : > { %v3832_v7 = vpop.eup %3831  ;;  %v1041_v8 = vadd.f32 1.0, %v3830_v5 }
 0x1e4   : > { %v1047_v11 = vadd.f32 1.0, %v3832_v7  ;;  %v3834_v12 = vpop.eup %3833 }
 0x1e5   : > { %3837 = vrcp.f32 %v1041_v8  ;;  %v3836_v15 = vpop.eup %3835  ;;  %v1054_v28 = vadd.f32 1.0, %v3834_v12  ;;  %v1555_v12 = vld [vmem:[#allocation13 + $0x28] sm:$0xff] }
 0x1e6   : > { %3839 = vrcp.f32 %v1047_v11  ;;  %v1551_v11 = vld [vmem:[#allocation13 + $0x8] sm:$0xff] }
 0x1e7   : > { %3841 = vrcp.f32 %v1054_v28 }
 0x1ef   : > { %v3838_v20 = vpop.eup %3837 }
 0x1f0   : > { %v3840_v21 = vpop.eup %3839  ;;  %v1058_v24 = vmul.f32 %v3838_v20, %v3836_v15  ;;  %v1553_v15 = vld [vmem:[#allocation13 + $0x18] sm:$0xff] }
 0x1f1   : > { %v1057_v30 = vmul.f32 %v3840_v21, %v468_v17  ;;  %v3842_v33 = vpop.eup %3841  ;;  %v4825_v17 = vpack.c.bf16 %v1555_v12, %v1551_v11  ;;  %v1557_v20 = vld [vmem:[#allocation13 + $0x38] sm:$0xff]  ;;  %v1550_v21 = vld [vmem:[#allocation13] sm:$0xff] }
 0x1f2   : > { %v4827_v28 = vpack.c.bf16 %v1557_v20, %v1553_v15 }
 0x1f3   : > { %v4774_v31 = vadd.f32 %v1058_v24, %v1057_v30  ;;  %v1554_v24 = vld [vmem:[#allocation13 + $0x20] sm:$0xff] }
 0x1f4   : > { %v4829_v30 = vpack.c.bf16 %v1554_v24, %v1550_v21  ;;  %v1820_v21 = vld [vmem:[#allocation13 + $0xe8] sm:$0xff]  ;;  %v1818_v24 = vld [vmem:[#allocation13 + $0xd8] sm:$0xff] }
 0x1f5   : > { %3843 = vtanh.f32 %v4774_v31 }
 0x1ff   : > { %v3844_v34 = vpop.eup %3843 }
 0x200   : > { %v1061_v35 = vmul.f32 %v3844_v34, %v3842_v33  ;;  %v1556_v33 = vld [vmem:[#allocation13 + $0x30] sm:$0xff] }
 0x202   : > { %1062 = vst [vmem:[%s4779_s27] sm:$0xff] %v1061_v35  ;;  %1197 = vmatmul.mubr.f32.vlgmr.msra.gmra.mrb[2].mxu0 %v1061_v35  ;;  %1268 = vmatmul.mubr.f32.vlgmr.msra.gmra.mrb[2].mxu1 %v1061_v35  ;;  %v1559_v35 = vld [vmem:[#allocation13 + $0x48] sm:$0xff] }
 0x203   : > { %3272 = vmatpush1.bf16.msra.mxu0 %v4604_v47  ;;  %3304 = vmatpush1.bf16.msra.mxu1 %v4607_v50 }
 0x204   : > { %3274 = vmatprep.subr.bf16.mxu0 %v4610_v53  ;;  %3306 = vmatprep.subr.bf16.mxu1 %v4612_v56 }
 0x205   : > { %1437 = vmatprep.mubr.f32.mxu0 %v4265_v0  ;;  %1508 = vmatprep.mubr.f32.mxu1 %v4265_v0 }
 0x207   : > { %3276 = vmatpush1.bf16.msra.mxu0 %v4616_v60  ;;  %3308 = vmatpush1.bf16.msra.mxu1 %v4620_v63 }
 0x208   : > { %3278 = vmatprep.subr.bf16.mxu0 %v4624_v3  ;;  %3310 = vmatprep.subr.bf16.mxu1 %v4627_v6 }
 0x20b   : > { %3280 = vmatpush1.bf16.msra.mxu0 %v4631_v10  ;;  %3312 = vmatpush1.bf16.msra.mxu1 %v4635_v13 }
 0x20c   : > { %3282 = vmatprep.subr.bf16.mxu0 %v4639_v16  ;;  %3314 = vmatprep.subr.bf16.mxu1 %v4642_v19 }
 0x20f   : > { %3284 = vmatpush1.bf16.msra.mxu0 %v4646_v23  ;;  %3316 = vmatpush1.bf16.msra.mxu1 %v4650_v26 }
 0x210   : > { %3286 = vmatprep.subr.bf16.mxu0 %v4654_v29  ;;  %3318 = vmatprep.subr.bf16.mxu1 %v4657_v32 }
 0x213   : > { %3288 = vmatpush1.bf16.msra.mxu0 %v4661_v36  ;;  %3320 = vmatpush1.bf16.msra.mxu1 %v4665_v40 }
 0x214   : > { %3290 = vmatprep.subr.bf16.mxu0 %v4669_v44  ;;  %3322 = vmatprep.subr.bf16.mxu1 %v4672_v48 }
 0x217   : > { %3292 = vmatpush1.bf16.msra.mxu0 %v4676_v54  ;;  %3324 = vmatpush1.bf16.msra.mxu1 %v4680_v58 }
 0x218   : > { %3294 = vmatprep.subr.bf16.mxu0 %v4684_v62  ;;  %3326 = vmatprep.subr.bf16.mxu1 %v4687_v4 }
 0x21b   : > { %3296 = vmatpush1.bf16.msra.mxu0 %v4691_v9  ;;  %3328 = vmatpush1.bf16.msra.mxu1 %v4695_v14 }
 0x21c   : > { %3298 = vmatprep.subr.bf16.mxu0 %v4699_v18  ;;  %3330 = vmatprep.subr.bf16.mxu1 %v4702_v22 }
 0x21f   : > { %3300 = vmatpush1.bf16.msra.mxu0 %v4706_v25  ;;  %3332 = vmatpush1.bf16.msra.mxu1 %v4710_v27 }
 0x220   : > { %3334 = vmatprep.subr.bf16.mxu0 %v4825_v17  ;;  %3366 = vmatprep.subr.bf16.mxu1 %v4827_v28 }
 0x2d5   : > { %v1198_v47 = vpop.f32.mrb[2].mxu0  ;;  %v1269_v50 = vpop.f32.mrb[2].mxu1 }
 0x2d6   : > { %v3655_v53 = vadd.f32 %v1198_v47, %v4760_v37  ;;  %v1200_v56 = vpop.f32.mrb[3].mxu0  ;;  %v1271_v60 = vpop.f32.mrb[3].mxu1  ;;  %v3671_v42 = vadd.f32 %v1269_v50, %v4769_v61  ;;  %v1563_v47 = vld [vmem:[#allocation13 + $0x68] sm:$0xff]  ;;  %v1561_v50 = vld [vmem:[#allocation13 + $0x58] sm:$0xff] }
 0x2d7   : > { %v3656_v63 = vadd.f32 %v1200_v56, %v4762_v39  ;;  %v3672_v10 = vadd.f32 %v1271_v60, %v4766_v55  ;;  %v1565_v56 = vld [vmem:[#allocation13 + $0x78] sm:$0xff]  ;;  %v1558_v60 = vld [vmem:[#allocation13 + $0x40] sm:$0xff] }
 0x2d8   : > { %v3041_v3 = vmul.f32 -1.442695, %v3655_v53  ;;  %v4837_v53 = vpack.c.bf16 %v1563_v47, %v1559_v35  ;;  %v1815_v35 = vld [vmem:[#allocation13 + $0xc0] sm:$0xff] }
 0x2d9   : > { %v3042_v6 = vmul.f32 -1.442695, %v3656_v63  ;;  %v3043_v13 = vmul.f32 -1.442695, %v3672_v10  ;;  %v1562_v63 = vld [vmem:[#allocation13 + $0x60] sm:$0xff]  ;;  %v1560_v10 = vld [vmem:[#allocation13 + $0x50] sm:$0xff] }
 0x2da   : > { %3845 = vpow2.f32 %v3041_v3  ;;  %v4839_v3 = vpack.c.bf16 %v1565_v56, %v1561_v50  ;;  %v1819_v47 = vld [vmem:[#allocation13 + $0xe0] sm:$0xff] }
 0x2db   : > { %3847 = vpow2.f32 %v3042_v6  ;;  %v4841_v6 = vpack.c.bf16 %v1562_v63, %v1558_v60  ;;  %v4908_v56 = vpack.c.bf16 %v1819_v47, %v1815_v35  ;;  %v1817_v60 = vld [vmem:[#allocation13 + $0xd0] sm:$0xff]  ;;  %v1850_v47 = vld [vmem:[#allocation13 + $0x1d8] sm:$0xff] }
 0x2dc   : > { %3849 = vpow2.f32 %v3043_v13  ;;  %v1564_v13 = vld [vmem:[#allocation13 + $0x70] sm:$0xff] }
 0x2dd   : > { %3851 = vtanh.f32 %v3671_v42  ;;  %v4844_v42 = vpack.c.bf16 %v1564_v13, %v1560_v10  ;;  %v1821_v63 = vld [vmem:[#allocation13 + $0xf0] sm:$0xff]  ;;  %v1824_v13 = vld [vmem:[#allocation13 + $0x108] sm:$0xff] }
 0x2de   : > { %v4911_v10 = vpack.c.bf16 %v1821_v63, %v1817_v60  ;;  %v1854_v60 = vld [vmem:[#allocation13 + $0x1f8] sm:$0xff]  ;;  %v1847_v63 = vld [vmem:[#allocation13 + $0x1c0] sm:$0xff] }
 0x2e4   : > { %v3846_v43 = vpop.eup %3845 }
 0x2e5   : > { %v3848_v45 = vpop.eup %3847  ;;  %v1281_v46 = vadd.f32 1.0, %v3846_v43  ;;  %v1567_v43 = vld [vmem:[#allocation13 + $0x88] sm:$0xff] }
 0x2e6   : > { %v1287_v38 = vadd.f32 1.0, %v3848_v45  ;;  %v3850_v41 = vpop.eup %3849  ;;  %v1571_v45 = vld [vmem:[#allocation13 + $0xa8] sm:$0xff] }
 0x2e7   : > { %3853 = vrcp.f32 %v1281_v46  ;;  %v3852_v49 = vpop.eup %3851  ;;  %v1294_v59 = vadd.f32 1.0, %v3850_v41  ;;  %v1569_v46 = vld [vmem:[#allocation13 + $0x98] sm:$0xff] }
 0x2e8   : > { %3855 = vrcp.f32 %v1287_v38  ;;  %v4849_v38 = vpack.c.bf16 %v1571_v45, %v1567_v43  ;;  %v1573_v41 = vld [vmem:[#allocation13 + $0xb8] sm:$0xff]  ;;  %v1828_v43 = vld [vmem:[#allocation13 + $0x128] sm:$0xff] }
 0x2e9   : > { %3857 = vrcp.f32 %v1294_v59  ;;  %v1568_v59 = vld [vmem:[#allocation13 + $0x90] sm:$0xff]  ;;  %v1826_v45 = vld [vmem:[#allocation13 + $0x118] sm:$0xff] }
 0x2f1   : > { %v3854_v51 = vpop.eup %3853 }
 0x2f2   : > { %v3856_v52 = vpop.eup %3855  ;;  %v1298_v57 = vmul.f32 %v3854_v51, %v3852_v49  ;;  %v1566_v49 = vld [vmem:[#allocation13 + $0x80] sm:$0xff] }
 0x2f3   : > { %v1297_v1 = vmul.f32 %v3856_v52, %v4774_v31  ;;  %v3858_v5 = vpop.eup %3857  ;;  %v1552_v31 = vld [vmem:[#allocation13 + $0x10] sm:$0xff]  ;;  %v1570_v51 = vld [vmem:[#allocation13 + $0xa0] sm:$0xff]  ;;  %v4851_v52 = vpack.c.bf16 %v1573_v41, %v1569_v46  ;;  %v4916_v46 = vpack.c.bf16 %v1828_v43, %v1824_v13  ;;  %v1830_v41 = vld [vmem:[#allocation13 + $0x138] sm:$0xff]  ;;  %v4952_v13 = vpack.c.bf16 %v1854_v60, %v1850_v47 }
 0x2f4   : > { %v4832_v34 = vpack.c.bf16 %v1556_v33, %v1552_v31  ;;  %v1822_v33 = vld [vmem:[#allocation13 + $0xf8] sm:$0xff]  ;;  %v1851_v43 = vld [vmem:[#allocation13 + $0x1e0] sm:$0xff] }
 0x2f5   : > { %v4819_v2 = vadd.f32 %v1298_v57, %v1297_v1  ;;  %v4853_v57 = vpack.c.bf16 %v1570_v51, %v1566_v49  ;;  %v1572_v1 = vld [vmem:[#allocation13 + $0xb0] sm:$0xff]  ;;  %v4906_v50 = vpack.c.bf16 %v1822_v33, %v1818_v24  ;;  %v1823_v49 = vld [vmem:[#allocation13 + $0x100] sm:$0xff]  ;;  %v1852_v24 = vld [vmem:[#allocation13 + $0x1e8] sm:$0xff] }
 0x2f6   : > { %v1827_v51 = vld [vmem:[#allocation13 + $0x120] sm:$0xff] }
 0x2f7   : > { %3859 = vtanh.f32 %v4819_v2 }
 0x301   : > { %v3860_v7 = vpop.eup %3859 }
 0x302   : > { %v1301_v8 = vmul.f32 %v3860_v7, %v3858_v5  ;;  %v4856_v5 = vpack.c.bf16 %v1572_v1, %v1568_v59  ;;  %v4918_v59 = vpack.c.bf16 %v1830_v41, %v1826_v45  ;;  %v4920_v1 = vpack.c.bf16 %v1827_v51, %v1823_v49  ;;  %v1849_v45 = vld [vmem:[#allocation13 + $0x1d0] sm:$0xff] }
 0x303   : > { %v1853_v41 = vld [vmem:[#allocation13 + $0x1f0] sm:$0xff]  ;;  %v4955_v49 = vpack.c.bf16 %v1851_v43, %v1847_v63 }
 0x304   : > { %3044 = vst [vmem:[%s4779_s27 + $0x8] sm:$0xff] %v1301_v8  ;;  %1438 = vmatmul.mubr.f32.vlgmr.msra.gmra.mrb[4].mxu0 %v1301_v8  ;;  %1509 = vmatmul.mubr.f32.vlgmr.msra.gmra.mrb[4].mxu1 %v1301_v8  ;;  %v4959_v51 = vpack.c.bf16 %v1853_v41, %v1849_v45 }
 0x305   : > { %1678 = vmatprep.mubr.f32.mxu0 %v4265_v0  ;;  %1749 = vmatprep.mubr.f32.mxu1 %v4265_v0 }
 0x306   : > { %3336 = vmatpush1.bf16.msra.mxu0 %v4829_v30  ;;  %3368 = vmatpush1.bf16.msra.mxu1 %v4832_v34 }
 0x307   : > { %3338 = vmatprep.subr.bf16.mxu0 %v4837_v53  ;;  %3370 = vmatprep.subr.bf16.mxu1 %v4839_v3 }
 0x30a   : > { %3340 = vmatpush1.bf16.msra.mxu0 %v4841_v6  ;;  %3372 = vmatpush1.bf16.msra.mxu1 %v4844_v42 }
 0x30b   : > { %3342 = vmatprep.subr.bf16.mxu0 %v4849_v38  ;;  %3374 = vmatprep.subr.bf16.mxu1 %v4851_v52 }
 0x30e   : > { %3344 = vmatpush1.bf16.msra.mxu0 %v4853_v57  ;;  %3376 = vmatpush1.bf16.msra.mxu1 %v4856_v5 }
 0x30f   : > { %3346 = vmatprep.subr.bf16.mxu0 %v4639_v16  ;;  %3378 = vmatprep.subr.bf16.mxu1 %v4642_v19 }
 0x312   : > { %3348 = vmatpush1.bf16.msra.mxu0 %v4646_v23  ;;  %3380 = vmatpush1.bf16.msra.mxu1 %v4650_v26 }
 0x313   : > { %3350 = vmatprep.subr.bf16.mxu0 %v4654_v29  ;;  %3382 = vmatprep.subr.bf16.mxu1 %v4657_v32 }
 0x316   : > { %3352 = vmatpush1.bf16.msra.mxu0 %v4661_v36  ;;  %3384 = vmatpush1.bf16.msra.mxu1 %v4665_v40 }
 0x317   : > { %3354 = vmatprep.subr.bf16.mxu0 %v4669_v44  ;;  %3386 = vmatprep.subr.bf16.mxu1 %v4672_v48 }
 0x31a   : > { %3356 = vmatpush1.bf16.msra.mxu0 %v4676_v54  ;;  %3388 = vmatpush1.bf16.msra.mxu1 %v4680_v58 }
 0x31b   : > { %3358 = vmatprep.subr.bf16.mxu0 %v4684_v62  ;;  %3390 = vmatprep.subr.bf16.mxu1 %v4687_v4 }
 0x31e   : > { %3360 = vmatpush1.bf16.msra.mxu0 %v4691_v9  ;;  %3392 = vmatpush1.bf16.msra.mxu1 %v4695_v14 }
 0x31f   : > { %3362 = vmatprep.subr.bf16.mxu0 %v4699_v18  ;;  %3394 = vmatprep.subr.bf16.mxu1 %v4702_v22 }
 0x322   : > { %3364 = vmatpush1.bf16.msra.mxu0 %v4706_v25  ;;  %3396 = vmatpush1.bf16.msra.mxu1 %v4710_v27 }
 0x323   : > { %3398 = vmatprep.subr.bf16.mxu0 %v4825_v17  ;;  %3430 = vmatprep.subr.bf16.mxu1 %v4827_v28 }
 0x3d7   : > { %v1439_v16 = vpop.f32.mrb[4].mxu0  ;;  %v1510_v19 = vpop.f32.mrb[4].mxu1 }
 0x3d8   : > { %v3657_v23 = vadd.f32 %v1439_v16, %v4760_v37  ;;  %v1441_v26 = vpop.f32.mrb[5].mxu0  ;;  %v1512_v29 = vpop.f32.mrb[5].mxu1  ;;  %v3673_v54 = vadd.f32 %v1510_v19, %v4769_v61  ;;  %v1825_v16 = vld [vmem:[#allocation13 + $0x110] sm:$0xff] }
 0x3d9   : > { %v3658_v32 = vadd.f32 %v1441_v26, %v4762_v39  ;;  %v3674_v44 = vadd.f32 %v1512_v29, %v4766_v55  ;;  %v1829_v19 = vld [vmem:[#allocation13 + $0x130] sm:$0xff]  ;;  %v1832_v26 = vld [vmem:[#allocation13 + $0x148] sm:$0xff] }
 0x3da   : > { %v3045_v36 = vmul.f32 -1.442695, %v3657_v23  ;;  %v4923_v23 = vpack.c.bf16 %v1829_v19, %v1825_v16  ;;  %v1836_v29 = vld [vmem:[#allocation13 + $0x168] sm:$0xff] }
 0x3db   : > { %v3046_v40 = vmul.f32 -1.442695, %v3658_v32  ;;  %v3047_v48 = vmul.f32 -1.442695, %v3674_v44  ;;  %v1834_v32 = vld [vmem:[#allocation13 + $0x158] sm:$0xff]  ;;  %v1831_v44 = vld [vmem:[#allocation13 + $0x140] sm:$0xff] }
 0x3dc   : > { %3861 = vpow2.f32 %v3045_v36  ;;  %v4927_v36 = vpack.c.bf16 %v1836_v29, %v1832_v26 }
 0x3dd   : > { %3863 = vpow2.f32 %v3046_v40  ;;  %v1838_v40 = vld [vmem:[#allocation13 + $0x178] sm:$0xff] }
 0x3de   : > { %3865 = vpow2.f32 %v3047_v48  ;;  %v1835_v48 = vld [vmem:[#allocation13 + $0x160] sm:$0xff] }
 0x3df   : > { %3867 = vtanh.f32 %v3673_v54  ;;  %v4930_v54 = vpack.c.bf16 %v1838_v40, %v1834_v32 }
 0x3e6   : > { %v3862_v58 = vpop.eup %3861 }
 0x3e7   : > { %v3864_v62 = vpop.eup %3863  ;;  %v1522_v4 = vadd.f32 1.0, %v3862_v58  ;;  %v4932_v58 = vpack.c.bf16 %v1835_v48, %v1831_v44 }
 0x3e8   : > { %v1528_v9 = vadd.f32 1.0, %v3864_v62  ;;  %v3866_v14 = vpop.eup %3865  ;;  %v1833_v62 = vld [vmem:[#allocation13 + $0x150] sm:$0xff] }
 0x3e9   : > { %3869 = vrcp.f32 %v1522_v4  ;;  %v3868_v18 = vpop.eup %3867  ;;  %v1535_v7 = vadd.f32 1.0, %v3866_v14  ;;  %v1837_v4 = vld [vmem:[#allocation13 + $0x170] sm:$0xff] }
 0x3ea   : > { %3871 = vrcp.f32 %v1528_v9  ;;  %v1840_v9 = vld [vmem:[#allocation13 + $0x188] sm:$0xff]  ;;  %v4935_v14 = vpack.c.bf16 %v1837_v4, %v1833_v62 }
 0x3eb   : > { %3873 = vrcp.f32 %v1535_v7 }
 0x3f3   : > { %v3870_v22 = vpop.eup %3869 }
 0x3f4   : > { %v3872_v25 = vpop.eup %3871  ;;  %v1539_v27 = vmul.f32 %v3870_v22, %v3868_v18  ;;  %v1844_v18 = vld [vmem:[#allocation13 + $0x1a8] sm:$0xff]  ;;  %v1842_v22 = vld [vmem:[#allocation13 + $0x198] sm:$0xff] }
 0x3f5   : > { %v1538_v8 = vmul.f32 %v3872_v25, %v4819_v2  ;;  %v3874_v12 = vpop.eup %3873  ;;  %v1816_v2 = vld [vmem:[#allocation13 + $0xc8] sm:$0xff]  ;;  %v1846_v25 = vld [vmem:[#allocation13 + $0x1b8] sm:$0xff] }
 0x3f6   : > { %v4904_v31 = vpack.c.bf16 %v1820_v21, %v1816_v2  ;;  %v4940_v7 = vpack.c.bf16 %v1846_v25, %v1842_v22  ;;  %v1845_v2 = vld [vmem:[#allocation13 + $0x1b0] sm:$0xff]  ;;  %v1848_v21 = vld [vmem:[#allocation13 + $0x1c8] sm:$0xff] }
 0x3f7   : > { %v4888_v11 = vadd.f32 %v1539_v27, %v1538_v8  ;;  %v4938_v27 = vpack.c.bf16 %v1844_v18, %v1840_v9  ;;  %v1839_v8 = vld [vmem:[#allocation13 + $0x180] sm:$0xff]  ;;  %v4949_v35 = vpack.c.bf16 %v1852_v24, %v1848_v21 }
 0x3f9   : > { %3875 = vtanh.f32 %v4888_v11 }
 0x403   : > { %v3876_v15 = vpop.eup %3875 }
 0x404   : > { %v1542_v20 = vmul.f32 %v3876_v15, %v3874_v12  ;;  %v1843_v12 = vld [vmem:[#allocation13 + $0x1a0] sm:$0xff]  ;;  %v1841_v15 = vld [vmem:[#allocation13 + $0x190] sm:$0xff] }
 0x405   : > { %v4947_v33 = vpack.c.bf16 %v1845_v2, %v1841_v15 }
 0x406   : > { %3048 = vst [vmem:[%s4779_s27 + $0x10] sm:$0xff] %v1542_v20  ;;  %1679 = vmatmul.mubr.f32.vlgmr.msra.gmra.mrb[6].mxu0 %v1542_v20  ;;  %1750 = vmatmul.mubr.f32.vlgmr.msra.gmra.mrb[6].mxu1 %v1542_v20  ;;  %v4943_v20 = vpack.c.bf16 %v1843_v12, %v1839_v8 }
 0x407   : > { %3400 = vmatpush1.bf16.msra.mxu0 %v4829_v30  ;;  %3432 = vmatpush1.bf16.msra.mxu1 %v4832_v34 }
 0x408   : > { %3402 = vmatprep.subr.bf16.mxu0 %v4837_v53  ;;  %3434 = vmatprep.subr.bf16.mxu1 %v4839_v3 }
 0x409   : > { %1919 = vmatprep.mubr.f32.mxu0 %v4265_v0  ;;  %1990 = vmatprep.mubr.f32.mxu1 %v4265_v0 }
 0x40b   : > { %3404 = vmatpush1.bf16.msra.mxu0 %v4841_v6  ;;  %3436 = vmatpush1.bf16.msra.mxu1 %v4844_v42 }
 0x40c   : > { %3406 = vmatprep.subr.bf16.mxu0 %v4849_v38  ;;  %3438 = vmatprep.subr.bf16.mxu1 %v4851_v52 }
 0x40f   : > { %3408 = vmatpush1.bf16.msra.mxu0 %v4853_v57  ;;  %3440 = vmatpush1.bf16.msra.mxu1 %v4856_v5 }
 0x410   : > { %3410 = vmatprep.subr.bf16.mxu0 %v4904_v31  ;;  %3442 = vmatprep.subr.bf16.mxu1 %v4906_v50 }
 0x413   : > { %3412 = vmatpush1.bf16.msra.mxu0 %v4908_v56  ;;  %3444 = vmatpush1.bf16.msra.mxu1 %v4911_v10 }
 0x414   : > { %3414 = vmatprep.subr.bf16.mxu0 %v4916_v46  ;;  %3446 = vmatprep.subr.bf16.mxu1 %v4918_v59 }
 0x417   : > { %3416 = vmatpush1.bf16.msra.mxu0 %v4920_v1  ;;  %3448 = vmatpush1.bf16.msra.mxu1 %v4923_v23 }
 0x418   : > { %3418 = vmatprep.subr.bf16.mxu0 %v4927_v36  ;;  %3450 = vmatprep.subr.bf16.mxu1 %v4930_v54 }
 0x41b   : > { %3420 = vmatpush1.bf16.msra.mxu0 %v4932_v58  ;;  %3452 = vmatpush1.bf16.msra.mxu1 %v4935_v14 }
 0x41c   : > { %3422 = vmatprep.subr.bf16.mxu0 %v4938_v27  ;;  %3454 = vmatprep.subr.bf16.mxu1 %v4940_v7 }
 0x41f   : > { %3424 = vmatpush1.bf16.msra.mxu0 %v4943_v20  ;;  %3456 = vmatpush1.bf16.msra.mxu1 %v4947_v33 }
 0x420   : > { %3426 = vmatprep.subr.bf16.mxu0 %v4949_v35  ;;  %3458 = vmatprep.subr.bf16.mxu1 %v4952_v13 }
 0x423   : > { %3428 = vmatpush1.bf16.msra.mxu0 %v4955_v49  ;;  %3460 = vmatpush1.bf16.msra.mxu1 %v4959_v51 }
 0x424   : > { %3462 = vmatprep.subr.bf16.mxu0 %v4825_v17  ;;  %3494 = vmatprep.subr.bf16.mxu1 %v4827_v28 }
 0x4d9   : > { %v1680_v16 = vpop.f32.mrb[6].mxu0  ;;  %v1751_v19 = vpop.f32.mrb[6].mxu1 }
 0x4da   : > { %v3659_v26 = vadd.f32 %v1680_v16, %v4760_v37  ;;  %v1682_v29 = vpop.f32.mrb[7].mxu0  ;;  %v1753_v32 = vpop.f32.mrb[7].mxu1  ;;  %v3675_v9 = vadd.f32 %v1751_v19, %v4769_v61 }
 0x4db   : > { %v3660_v40 = vadd.f32 %v1682_v29, %v4762_v39  ;;  %v3676_v62 = vadd.f32 %v1753_v32, %v4766_v55 }
 0x4dc   : > { %v3049_v44 = vmul.f32 -1.442695, %v3659_v26 }
 0x4dd   : > { %v3050_v48 = vmul.f32 -1.442695, %v3660_v40  ;;  %v3051_v4 = vmul.f32 -1.442695, %v3676_v62 }
 0x4de   : > { %3877 = vpow2.f32 %v3049_v44 }
 0x4df   : > { %3879 = vpow2.f32 %v3050_v48 }
 0x4e0   : > { %3881 = vpow2.f32 %v3051_v4 }
 0x4e1   : > { %3883 = vtanh.f32 %v3675_v9 }
 0x4e8   : > { %v3878_v18 = vpop.eup %3877 }
 0x4e9   : > { %v3880_v22 = vpop.eup %3879  ;;  %v1763_v25 = vadd.f32 1.0, %v3878_v18 }
 0x4ea   : > { %v1769_v8 = vadd.f32 1.0, %v3880_v22  ;;  %v3882_v12 = vpop.eup %3881 }
 0x4eb   : > { %3885 = vrcp.f32 %v1763_v25  ;;  %v3884_v15 = vpop.eup %3883  ;;  %v1776_v47 = vadd.f32 1.0, %v3882_v12 }
 0x4ec   : > { %3887 = vrcp.f32 %v1769_v8 }
 0x4ed   : > { %3889 = vrcp.f32 %v1776_v47 }
 0x4f5   : > { %v3886_v2 = vpop.eup %3885 }
 0x4f6   : > { %v3888_v21 = vpop.eup %3887  ;;  %v1780_v24 = vmul.f32 %v3886_v2, %v3884_v15 }
 0x4f7   : > { %v1779_v60 = vmul.f32 %v3888_v21, %v4888_v11  ;;  %v3890_v43 = vpop.eup %3889 }
 0x4f9   : > { %v4971_v63 = vadd.f32 %v1780_v24, %v1779_v60 }
 0x4fb   : > { %3891 = vtanh.f32 %v4971_v63 }
 0x505   : > { %v3892_v45 = vpop.eup %3891 }
 0x506   : > { %v1783_v41 = vmul.f32 %v3892_v45, %v3890_v43 }
 0x508   : > { %3052 = vst [vmem:[%s4779_s27 + $0x18] sm:$0xff] %v1783_v41  ;;  %1920 = vmatmul.mubr.f32.vlgmr.msra.gmra.mrb[8].mxu0 %v1783_v41  ;;  %1991 = vmatmul.mubr.f32.vlgmr.msra.gmra.mrb[8].mxu1 %v1783_v41 }
 0x509   : > { %3464 = vmatpush1.bf16.msra.mxu0 %v4829_v30  ;;  %3496 = vmatpush1.bf16.msra.mxu1 %v4832_v34 }
 0x50a   : > { %3466 = vmatprep.subr.bf16.mxu0 %v4837_v53  ;;  %3498 = vmatprep.subr.bf16.mxu1 %v4839_v3 }
 0x50b   : > { %2160 = vmatprep.mubr.f32.mxu0 %v4265_v0  ;;  %2231 = vmatprep.mubr.f32.mxu1 %v4265_v0 }
 0x50d   : > { %3468 = vmatpush1.bf16.msra.mxu0 %v4841_v6  ;;  %3500 = vmatpush1.bf16.msra.mxu1 %v4844_v42 }
 0x50e   : > { %3470 = vmatprep.subr.bf16.mxu0 %v4849_v38  ;;  %3502 = vmatprep.subr.bf16.mxu1 %v4851_v52 }
 0x511   : > { %3472 = vmatpush1.bf16.msra.mxu0 %v4853_v57  ;;  %3504 = vmatpush1.bf16.msra.mxu1 %v4856_v5 }
 0x512   : > { %3474 = vmatprep.subr.bf16.mxu0 %v4904_v31  ;;  %3506 = vmatprep.subr.bf16.mxu1 %v4906_v50 }
 0x515   : > { %3476 = vmatpush1.bf16.msra.mxu0 %v4908_v56  ;;  %3508 = vmatpush1.bf16.msra.mxu1 %v4911_v10 }
 0x516   : > { %3478 = vmatprep.subr.bf16.mxu0 %v4916_v46  ;;  %3510 = vmatprep.subr.bf16.mxu1 %v4918_v59 }
 0x519   : > { %3480 = vmatpush1.bf16.msra.mxu0 %v4920_v1  ;;  %3512 = vmatpush1.bf16.msra.mxu1 %v4923_v23 }
 0x51a   : > { %3482 = vmatprep.subr.bf16.mxu0 %v4927_v36  ;;  %3514 = vmatprep.subr.bf16.mxu1 %v4930_v54 }
 0x51d   : > { %3484 = vmatpush1.bf16.msra.mxu0 %v4932_v58  ;;  %3516 = vmatpush1.bf16.msra.mxu1 %v4935_v14 }
 0x51e   : > { %3486 = vmatprep.subr.bf16.mxu0 %v4938_v27  ;;  %3518 = vmatprep.subr.bf16.mxu1 %v4940_v7 }
 0x521   : > { %3488 = vmatpush1.bf16.msra.mxu0 %v4943_v20  ;;  %3520 = vmatpush1.bf16.msra.mxu1 %v4947_v33 }
 0x522   : > { %3490 = vmatprep.subr.bf16.mxu0 %v4949_v35  ;;  %3522 = vmatprep.subr.bf16.mxu1 %v4952_v13 }
 0x525   : > { %3492 = vmatpush1.bf16.msra.mxu0 %v4955_v49  ;;  %3524 = vmatpush1.bf16.msra.mxu1 %v4959_v51 }
 0x526   : > { %3526 = vmatprep.subr.bf16.mxu0 %v4825_v17  ;;  %3558 = vmatprep.subr.bf16.mxu1 %v4827_v28 }
 0x5db   : > { %v1921_v11 = vpop.f32.mrb[8].mxu0  ;;  %v1992_v16 = vpop.f32.mrb[8].mxu1 }
 0x5dc   : > { %v3661_v19 = vadd.f32 %v1921_v11, %v4760_v37  ;;  %v1923_v26 = vpop.f32.mrb[9].mxu0  ;;  %v1994_v29 = vpop.f32.mrb[9].mxu1  ;;  %v3677_v4 = vadd.f32 %v1992_v16, %v4769_v61 }
 0x5dd   : > { %v3662_v32 = vadd.f32 %v1923_v26, %v4762_v39  ;;  %v3678_v48 = vadd.f32 %v1994_v29, %v4766_v55 }
 0x5de   : > { %v3053_v40 = vmul.f32 -1.442695, %v3661_v19 }
 0x5df   : > { %v3054_v44 = vmul.f32 -1.442695, %v3662_v32  ;;  %v3055_v62 = vmul.f32 -1.442695, %v3678_v48 }
 0x5e0   : > { %3893 = vpow2.f32 %v3053_v40 }
 0x5e1   : > { %3895 = vpow2.f32 %v3054_v44 }
 0x5e2   : > { %3897 = vpow2.f32 %v3055_v62 }
 0x5e3   : > { %3899 = vtanh.f32 %v3677_v4 }
 0x5ea   : > { %v3894_v17 = vpop.eup %3893 }
 0x5eb   : > { %v3896_v9 = vpop.eup %3895  ;;  %v2004_v28 = vadd.f32 1.0, %v3894_v17 }
 0x5ec   : > { %v2010_v18 = vadd.f32 1.0, %v3896_v9  ;;  %v3898_v22 = vpop.eup %3897 }
 0x5ed   : > { %3901 = vrcp.f32 %v2004_v28  ;;  %v3900_v25 = vpop.eup %3899  ;;  %v2017_v2 = vadd.f32 1.0, %v3898_v22  ;;  %v2515_v28 = vld [vmem:[#allocation13 + $0x8] sm:$0xff]  ;;  %v2517_v22 = vld [vmem:[#allocation13 + $0x18] sm:$0xff] }
 0x5ee   : > { %3903 = vrcp.f32 %v2010_v18  ;;  %v2519_v18 = vld [vmem:[#allocation13 + $0x28] sm:$0xff] }
 0x5ef   : > { %3905 = vrcp.f32 %v2017_v2 }
 0x5f7   : > { %v3902_v8 = vpop.eup %3901 }
 0x5f8   : > { %v3904_v12 = vpop.eup %3903  ;;  %v2021_v15 = vmul.f32 %v3902_v8, %v3900_v25  ;;  %v3589_v25 = vpack.c.bf16 %v2519_v18, %v2515_v28  ;;  %v2521_v8 = vld [vmem:[#allocation13 + $0x38] sm:$0xff] }
 0x5f9   : > { %v2020_v21 = vmul.f32 %v3904_v12, %v4971_v63  ;;  %v3906_v47 = vpop.eup %3905  ;;  %v2514_v12 = vld [vmem:[#allocation13] sm:$0xff]  ;;  %v3621_v2 = vpack.c.bf16 %v2521_v8, %v2517_v22 }
 0x5fb   : > { %v5014_v24 = vadd.f32 %v2021_v15, %v2020_v21  ;;  %v2518_v15 = vld [vmem:[#allocation13 + $0x20] sm:$0xff] }
 0x5fc   : > { %v3591_v21 = vpack.c.bf16 %v2518_v15, %v2514_v12 }
 0x5fd   : > { %3907 = vtanh.f32 %v5014_v24 }
 0x607   : > { %v3908_v60 = vpop.eup %3907 }
 0x608   : > { %v2024_v43 = vmul.f32 %v3908_v60, %v3906_v47  ;;  %v2520_v47 = vld [vmem:[#allocation13 + $0x30] sm:$0xff] }
 0x60a   : > { %3056 = vst [vmem:[%s4779_s27 + $0x20] sm:$0xff] %v2024_v43  ;;  %2161 = vmatmul.mubr.f32.vlgmr.msra.gmra.mrb[10].mxu0 %v2024_v43  ;;  %2232 = vmatmul.mubr.f32.vlgmr.msra.gmra.mrb[10].mxu1 %v2024_v43  ;;  %v2523_v43 = vld [vmem:[#allocation13 + $0x48] sm:$0xff] }
 0x60b   : > { %3528 = vmatpush1.bf16.msra.mxu0 %v4829_v30  ;;  %3560 = vmatpush1.bf16.msra.mxu1 %v4832_v34 }
 0x60c   : > { %3530 = vmatprep.subr.bf16.mxu0 %v4837_v53  ;;  %3562 = vmatprep.subr.bf16.mxu1 %v4839_v3 }
 0x60d   : > { %2401 = vmatprep.mubr.f32.mxu0 %v4265_v0  ;;  %2472 = vmatprep.mubr.f32.mxu1 %v4265_v0 }
 0x60f   : > { %3532 = vmatpush1.bf16.msra.mxu0 %v4841_v6  ;;  %3564 = vmatpush1.bf16.msra.mxu1 %v4844_v42 }
 0x610   : > { %3534 = vmatprep.subr.bf16.mxu0 %v4849_v38  ;;  %3566 = vmatprep.subr.bf16.mxu1 %v4851_v52 }
 0x613   : > { %3536 = vmatpush1.bf16.msra.mxu0 %v4853_v57  ;;  %3568 = vmatpush1.bf16.msra.mxu1 %v4856_v5 }
 0x614   : > { %3538 = vmatprep.subr.bf16.mxu0 %v4904_v31  ;;  %3570 = vmatprep.subr.bf16.mxu1 %v4906_v50 }
 0x617   : > { %3540 = vmatpush1.bf16.msra.mxu0 %v4908_v56  ;;  %3572 = vmatpush1.bf16.msra.mxu1 %v4911_v10 }
 0x618   : > { %3542 = vmatprep.subr.bf16.mxu0 %v4916_v46  ;;  %3574 = vmatprep.subr.bf16.mxu1 %v4918_v59 }
 0x61b   : > { %3544 = vmatpush1.bf16.msra.mxu0 %v4920_v1  ;;  %3576 = vmatpush1.bf16.msra.mxu1 %v4923_v23 }
 0x61c   : > { %3546 = vmatprep.subr.bf16.mxu0 %v4927_v36  ;;  %3578 = vmatprep.subr.bf16.mxu1 %v4930_v54 }
 0x61f   : > { %3548 = vmatpush1.bf16.msra.mxu0 %v4932_v58  ;;  %3580 = vmatpush1.bf16.msra.mxu1 %v4935_v14 }
 0x620   : > { %3550 = vmatprep.subr.bf16.mxu0 %v4938_v27  ;;  %3582 = vmatprep.subr.bf16.mxu1 %v4940_v7 }
 0x623   : > { %3552 = vmatpush1.bf16.msra.mxu0 %v4943_v20  ;;  %3584 = vmatpush1.bf16.msra.mxu1 %v4947_v33 }
 0x624   : > { %3554 = vmatprep.subr.bf16.mxu0 %v4949_v35  ;;  %3586 = vmatprep.subr.bf16.mxu1 %v4952_v13 }
 0x627   : > { %3556 = vmatpush1.bf16.msra.mxu0 %v4955_v49  ;;  %3588 = vmatpush1.bf16.msra.mxu1 %v4959_v51 }
 0x628   : > { %3590 = vmatprep.subr.bf16.mxu0 %v3589_v25  ;;  %3622 = vmatprep.subr.bf16.mxu1 %v3621_v2 }
 0x6dd   : > { %v2162_v30 = vpop.f32.mrb[10].mxu0  ;;  %v2233_v34 = vpop.f32.mrb[10].mxu1 }
 0x6de   : > { %v3663_v53 = vadd.f32 %v2162_v30, %v4760_v37  ;;  %v2164_v3 = vpop.f32.mrb[11].mxu0  ;;  %v2235_v6 = vpop.f32.mrb[11].mxu1  ;;  %v3679_v63 = vadd.f32 %v2233_v34, %v4769_v61  ;;  %v2527_v30 = vld [vmem:[#allocation13 + $0x68] sm:$0xff]  ;;  %v2525_v34 = vld [vmem:[#allocation13 + $0x58] sm:$0xff] }
 0x6df   : > { %v3664_v42 = vadd.f32 %v2164_v3, %v4762_v39  ;;  %v3680_v57 = vadd.f32 %v2235_v6, %v4766_v55  ;;  %v2522_v3 = vld [vmem:[#allocation13 + $0x40] sm:$0xff] }
 0x6e0   : > { %v3057_v38 = vmul.f32 -1.442695, %v3663_v53  ;;  %v2529_v53 = vld [vmem:[#allocation13 + $0x78] sm:$0xff]  ;;  %v2526_v6 = vld [vmem:[#allocation13 + $0x60] sm:$0xff] }
 0x6e1   : > { %v3058_v52 = vmul.f32 -1.442695, %v3664_v42  ;;  %v3059_v5 = vmul.f32 -1.442695, %v3680_v57  ;;  %v3625_v42 = vpack.c.bf16 %v2529_v53, %v2525_v34  ;;  %v2528_v57 = vld [vmem:[#allocation13 + $0x70] sm:$0xff] }
 0x6e2   : > { %3909 = vpow2.f32 %v3057_v38  ;;  %v3595_v38 = vpack.c.bf16 %v2526_v6, %v2522_v3 }
 0x6e3   : > { %3911 = vpow2.f32 %v3058_v52  ;;  %v2524_v52 = vld [vmem:[#allocation13 + $0x50] sm:$0xff] }
 0x6e4   : > { %3913 = vpow2.f32 %v3059_v5  ;;  %v3627_v5 = vpack.c.bf16 %v2528_v57, %v2524_v52 }
 0x6e5   : > { %3915 = vtanh.f32 %v3679_v63  ;;  %v2531_v63 = vld [vmem:[#allocation13 + $0x88] sm:$0xff] }
 0x6ec   : > { %v3910_v45 = vpop.eup %3909 }
 0x6ed   : > { %v3912_v41 = vpop.eup %3911  ;;  %v2245_v11 = vadd.f32 1.0, %v3910_v45  ;;  %v2535_v45 = vld [vmem:[#allocation13 + $0xa8] sm:$0xff] }
 0x6ee   : > { %v2251_v16 = vadd.f32 1.0, %v3912_v41  ;;  %v3914_v19 = vpop.eup %3913  ;;  %v2533_v41 = vld [vmem:[#allocation13 + $0x98] sm:$0xff] }
 0x6ef   : > { %3917 = vrcp.f32 %v2245_v11  ;;  %v3916_v26 = vpop.eup %3915  ;;  %v2258_v44 = vadd.f32 1.0, %v3914_v19  ;;  %v3597_v11 = vpack.c.bf16 %v2535_v45, %v2531_v63  ;;  %v2530_v19 = vld [vmem:[#allocation13 + $0x80] sm:$0xff] }
 0x6f0   : > { %3919 = vrcp.f32 %v2251_v16  ;;  %v2537_v16 = vld [vmem:[#allocation13 + $0xb8] sm:$0xff] }
 0x6f1   : > { %3921 = vrcp.f32 %v2258_v44  ;;  %v2536_v44 = vld [vmem:[#allocation13 + $0xb0] sm:$0xff] }
 0x6f9   : > { %v3918_v29 = vpop.eup %3917 }
 0x6fa   : > { %v3920_v32 = vpop.eup %3919  ;;  %v2262_v40 = vmul.f32 %v3918_v29, %v3916_v26  ;;  %v2534_v26 = vld [vmem:[#allocation13 + $0xa0] sm:$0xff]  ;;  %v3629_v29 = vpack.c.bf16 %v2537_v16, %v2533_v41 }
 0x6fb   : > { %v2261_v48 = vmul.f32 %v3920_v32, %v5014_v24  ;;  %v3922_v4 = vpop.eup %3921  ;;  %v2516_v24 = vld [vmem:[#allocation13 + $0x10] sm:$0xff]  ;;  %v3599_v32 = vpack.c.bf16 %v2534_v26, %v2530_v19 }
 0x6fc   : > { %v3623_v60 = vpack.c.bf16 %v2520_v47, %v2516_v24 }
 0x6fd   : > { %v5055_v62 = vadd.f32 %v2262_v40, %v2261_v48  ;;  %v2532_v40 = vld [vmem:[#allocation13 + $0x90] sm:$0xff] }
 0x6fe   : > { %v3631_v48 = vpack.c.bf16 %v2536_v44, %v2532_v40 }
 0x6ff   : > { %3923 = vtanh.f32 %v5055_v62 }
 0x709   : > { %v3924_v17 = vpop.eup %3923 }
 0x70a   : > { %v2265_v9 = vmul.f32 %v3924_v17, %v3922_v4 }
 0x70c   : > { %3060 = vst [vmem:[%s4779_s27 + $0x28] sm:$0xff] %v2265_v9  ;;  %2402 = vmatmul.mubr.f32.vlgmr.msra.gmra.mrb[12].mxu0 %v2265_v9  ;;  %2473 = vmatmul.mubr.f32.vlgmr.msra.gmra.mrb[12].mxu1 %v2265_v9 }
 0x70d   : > { %2642 = vmatprep.mubr.f32.mxu0 %v4265_v0  ;;  %2713 = vmatprep.mubr.f32.mxu1 %v4265_v0  ;;  %v3593_v0 = vpack.c.bf16 %v2527_v30, %v2523_v43 }
 0x70e   : > { %3592 = vmatpush1.bf16.msra.mxu0 %v3591_v21  ;;  %3624 = vmatpush1.bf16.msra.mxu1 %v3623_v60 }
 0x70f   : > { %3594 = vmatprep.subr.bf16.mxu0 %v3593_v0  ;;  %3626 = vmatprep.subr.bf16.mxu1 %v3625_v42 }
 0x712   : > { %3596 = vmatpush1.bf16.msra.mxu0 %v3595_v38  ;;  %3628 = vmatpush1.bf16.msra.mxu1 %v3627_v5 }
 0x713   : > { %3598 = vmatprep.subr.bf16.mxu0 %v3597_v11  ;;  %3630 = vmatprep.subr.bf16.mxu1 %v3629_v29 }
 0x716   : > { %3600 = vmatpush1.bf16.msra.mxu0 %v3599_v32  ;;  %3632 = vmatpush1.bf16.msra.mxu1 %v3631_v48 }
 0x717   : > { %3602 = vmatprep.subr.bf16.mxu0 %v4904_v31  ;;  %3634 = vmatprep.subr.bf16.mxu1 %v4906_v50 }
 0x71a   : > { %3604 = vmatpush1.bf16.msra.mxu0 %v4908_v56  ;;  %3636 = vmatpush1.bf16.msra.mxu1 %v4911_v10 }
 0x71b   : > { %3606 = vmatprep.subr.bf16.mxu0 %v4916_v46  ;;  %3638 = vmatprep.subr.bf16.mxu1 %v4918_v59 }
 0x71e   : > { %3608 = vmatpush1.bf16.msra.mxu0 %v4920_v1  ;;  %3640 = vmatpush1.bf16.msra.mxu1 %v4923_v23 }
 0x71f   : > { %3610 = vmatprep.subr.bf16.mxu0 %v4927_v36  ;;  %3642 = vmatprep.subr.bf16.mxu1 %v4930_v54 }
 0x722   : > { %3612 = vmatpush1.bf16.msra.mxu0 %v4932_v58  ;;  %3644 = vmatpush1.bf16.msra.mxu1 %v4935_v14 }
 0x723   : > { %3614 = vmatprep.subr.bf16.mxu0 %v4938_v27  ;;  %3646 = vmatprep.subr.bf16.mxu1 %v4940_v7 }
 0x726   : > { %3616 = vmatpush1.bf16.msra.mxu0 %v4943_v20  ;;  %3648 = vmatpush1.bf16.msra.mxu1 %v4947_v33 }
 0x727   : > { %3618 = vmatprep.subr.bf16.mxu0 %v4949_v35  ;;  %3650 = vmatprep.subr.bf16.mxu1 %v4952_v13 }
 0x72a   : > { %3620 = vmatpush1.bf16.msra.mxu0 %v4955_v49  ;;  %3652 = vmatpush1.bf16.msra.mxu1 %v4959_v51 }
 0x7df   : > { %v2403_v31 = vpop.f32.mrb[12].mxu0  ;;  %v2474_v50 = vpop.f32.mrb[12].mxu1 }
 0x7e0   : > { %v3665_v56 = vadd.f32 %v2403_v31, %v4760_v37  ;;  %v2405_v10 = vpop.f32.mrb[13].mxu0  ;;  %v2476_v46 = vpop.f32.mrb[13].mxu1  ;;  %v3681_v58 = vadd.f32 %v2474_v50, %v4769_v61 }
 0x7e1   : > { %v3666_v59 = vadd.f32 %v2405_v10, %v4762_v39  ;;  %v3682_v36 = vadd.f32 %v2476_v46, %v4766_v55 }
 0x7e2   : > { %v3061_v1 = vmul.f32 -1.442695, %v3665_v56 }
 0x7e3   : > { %v3062_v23 = vmul.f32 -1.442695, %v3666_v59  ;;  %v3063_v54 = vmul.f32 -1.442695, %v3682_v36 }
 0x7e4   : > { %3925 = vpow2.f32 %v3061_v1 }
 0x7e5   : > { %3927 = vpow2.f32 %v3062_v23 }
 0x7e6   : > { %3929 = vpow2.f32 %v3063_v54 }
 0x7e7   : > { %3931 = vtanh.f32 %v3681_v58 }
 0x7ee   : > { %v3926_v14 = vpop.eup %3925 }
 0x7ef   : > { %v3928_v27 = vpop.eup %3927  ;;  %v2486_v7 = vadd.f32 1.0, %v3926_v14 }
 0x7f0   : > { %v2492_v20 = vadd.f32 1.0, %v3928_v27  ;;  %v3930_v33 = vpop.eup %3929 }
 0x7f1   : > { %3933 = vrcp.f32 %v2486_v7  ;;  %v3932_v35 = vpop.eup %3931  ;;  %v2499_v4 = vadd.f32 1.0, %v3930_v33 }
 0x7f2   : > { %3935 = vrcp.f32 %v2492_v20 }
 0x7f3   : > { %3937 = vrcp.f32 %v2499_v4 }
 0x7fb   : > { %v3934_v13 = vpop.eup %3933 }
 0x7fc   : > { %v3936_v49 = vpop.eup %3935  ;;  %v2503_v51 = vmul.f32 %v3934_v13, %v3932_v35 }
 0x7fd   : > { %v2502_v17 = vmul.f32 %v3936_v49, %v5055_v62  ;;  %v3938_v28 = vpop.eup %3937 }
 0x7ff   : > { %v2504_v9 = vadd.f32 %v2503_v51, %v2502_v17 }
 0x801   : > { %3939 = vtanh.f32 %v2504_v9 }
 0x80b   : > { %v3940_v18 = vpop.eup %3939 }
 0x80c   : > { %v2506_v22 = vmul.f32 %v3940_v18, %v3938_v28 }
 0x80e   : > { %3064 = vst [vmem:[%s4779_s27 + $0x30] sm:$0xff] %v2506_v22  ;;  %2643 = vmatmul.mubr.f32.vlgmr.msra.gmra.mrb[14].mxu0 %v2506_v22  ;;  %2714 = vmatmul.mubr.f32.vlgmr.msra.gmra.mrb[14].mxu1 %v2506_v22 }
 0x8e1   : > { %v2644_v25 = vpop.f32.mrb[14].mxu0  ;;  %v2715_v8 = vpop.f32.mrb[14].mxu1 }
 0x8e2   : > { %v3667_v12 = vadd.f32 %v2644_v25, %v4760_v37  ;;  %v2646_v15 = vpop.f32.mrb[15].mxu0  ;;  %v2717_v2 = vpop.f32.mrb[15].mxu1  ;;  %v3683_v43 = vadd.f32 %v2715_v8, %v4769_v61 }
 0x8e3   : > { %v3668_v21 = vadd.f32 %v2646_v15, %v4762_v39  ;;  %v3684_v62 = vadd.f32 %v2717_v2, %v4766_v55 }
 0x8e4   : > { %v3065_v24 = vmul.f32 -1.442695, %v3667_v12 }
 0x8e5   : > { %v3066_v47 = vmul.f32 -1.442695, %v3668_v21  ;;  %v3067_v60 = vmul.f32 -1.442695, %v3684_v62 }
 0x8e6   : > { %3941 = vpow2.f32 %v3065_v24 }
 0x8e7   : > { %3943 = vpow2.f32 %v3066_v47 }
 0x8e8   : > { %3945 = vpow2.f32 %v3067_v60 }
 0x8e9   : > { %3947 = vtanh.f32 %v3683_v43 }
 0x8f0   : > { %v3942_v30 = vpop.eup %3941 }
 0x8f1   : > { %v3944_v34 = vpop.eup %3943  ;;  %v2727_v0 = vadd.f32 1.0, %v3942_v30 }
 0x8f2   : > { %v2733_v37 = vadd.f32 1.0, %v3944_v34  ;;  %v3946_v39 = vpop.eup %3945 }
 0x8f3   : > { %3949 = vrcp.f32 %v2727_v0  ;;  %v3948_v53 = vpop.eup %3947  ;;  %v2740_v42 = vadd.f32 1.0, %v3946_v39 }
 0x8f4   : > { %3951 = vrcp.f32 %v2733_v37 }
 0x8f5   : > { %3953 = vrcp.f32 %v2740_v42 }
 0x8fd   : > { %v3950_v3 = vpop.eup %3949 }
 0x8fe   : > { %v3952_v6 = vpop.eup %3951  ;;  %v2744_v55 = vmul.f32 %v3950_v3, %v3948_v53 }
 0x8ff   : > { %v2743_v38 = vmul.f32 %v3952_v6, %v2504_v9  ;;  %v3954_v52 = vpop.eup %3953 }
 0x901   : > { %v2745_v61 = vadd.f32 %v2744_v55, %v2743_v38 }
 0x903   : > { %3955 = vtanh.f32 %v2745_v61  ;;  %2756 = vst [vmem:[%s459_s20] sm:$0xff] %v2745_v61  ;;  %s4107_s20 = sshll.u32 %s4266_s10, 4  ;;  %s4108_s20 = int_to_ptr.vmem [resolvable:$false] %s4107_s20 }
 0x904   : > { %p4110_p11 = scmp.lt.s32.totalorder %s5107_s1, %s4108_s20 }
 0x90d   : > { %v3956_v57 = vpop.eup %3955 }
 0x90e   : > { %v2747_v5 = vmul.f32 %v3956_v57, %v3954_v52 }
 0x910   : > { %3068 = vst [vmem:[%s4779_s27 + $0x38] sm:$0xff] %v2747_v5  ;;  %2755 = vst [vmem:[%s452_s25] sm:$0xff] %v2747_v5  ;;  %s4109_s27 = scalar_lea.vmem %s4108_s20, 256 }
 0x911   : > { %p4111_p6 = scmp.lt.s32.totalorder %s4109_s27, %s4103_s13 }
 0x913   : > { %p4112_p13 = por %p4111_p6, %p4110_p11 }
 0x915   : > { %p4113_p8 = pnand %p4112_p13, %p4106_p3 }
 0x917   : > { %4116 = shalt.err (!%p4113_p8)
}
 0x918   : > { %s4117_s11 = scalar_lea.hbm %s5105_s19, 128  ;;  %s4121_s25 = scalar_lea.hbm %s5282_s8, 256 }
 0x919   : > { %p4118_p0 = scmp.ne.s32.totalorder %s5105_s19, %s4117_s11  ;;  %p4122_p7 = scmp.lt.u32.totalorder %s5105_s19, %s5282_s8 }
 0x91a   : > { %p4123_p1 = scmp.lt.u32.totalorder %s4121_s25, %s4117_s11  ;;  %p4125_p2 = scmp.lt.u32.totalorder %s4117_s11, %s5105_s19 }
 0x91b   : > { %p4119_p5 = pnand %p4118_p0, %p5284_p4 }
 0x91c   : > { %p4124_p9 = por %p4123_p1, %p4122_p7 }
 0x91d   : > { %p4120_p12 = pneg %p4119_p5 }
 0x91e   : > { %p4126_p10 = por %p4125_p2, %p4124_p9 }
 0x920   : > { %p4127_p3 = pnand %p4126_p10, %p4120_p12 }
 0x922   : > { %4130 = shalt.err (!%p4127_p3)
}
 0x923   : > { %3732 = dma.vmem_to_hbm [thread:$0]  (%p5284_p4), %s5107_s1, 128, %s5105_s19, %s5119_s24  }
 0x924   : > { %s2758_s17 = scalar_lea.sflag [#allocation7], %s4569_s22  ;;  %s4131_s18 = scalar_lea.vmem %s5094_s9, 1024 }
 0x925   : > { %p4132_p11 = scmp.ne.s32.totalorder %s5094_s9, %s4131_s18  ;;  %s4267_s30 = smov [#allocation14]  }
 0x926   : > { %s4135_s16 = sshll.u32 %s4267_s30, 4  ;;  %s4136_s16 = int_to_ptr.vmem [resolvable:$false] %s4135_s16 }
 0x927   : > { %p4133_p6 = pnand %p4132_p11, %p5284_p4  ;;  %s4137_s13 = scalar_lea.vmem %s4136_s16, 2048 }
 0x928   : > { %p4138_p8 = scmp.lt.s32.totalorder %s5094_s9, %s4136_s16  ;;  %p4139_p0 = scmp.lt.s32.totalorder %s4137_s13, %s4131_s18 }
 0x929   : > { %p4134_p13 = pneg %p4133_p6 }
 0x92a   : > { %p4140_p5 = por %p4139_p0, %p4138_p8 }
 0x92c   : > { %p4141_p12 = pnand %p4140_p5, %p4134_p13 }
 0x92e   : > { %4144 = shalt.err (!%p4141_p12)
}
 0x92f   : > { %s4145_s1 = scalar_lea.hbm %s5100_s14, 1024  ;;  %s4149_s20 = scalar_lea.hbm %s5220_s6, 2048 }
 0x930   : > { %p4146_p7 = scmp.ne.s32.totalorder %s5100_s14, %s4145_s1  ;;  %p4150_p2 = scmp.lt.u32.totalorder %s5100_s14, %s5220_s6 }
 0x931   : > { %p4151_p10 = scmp.lt.u32.totalorder %s4149_s20, %s4145_s1  ;;  %p4153_p11 = scmp.lt.u32.totalorder %s4145_s1, %s5100_s14 }
 0x932   : > { %p4147_p1 = pnand %p4146_p7, %p5284_p4 }
 0x933   : > { %p4152_p3 = por %p4151_p10, %p4150_p2 }
 0x934   : > { %p4148_p9 = pneg %p4147_p1 }
 0x935   : > { %p4154_p6 = por %p4153_p11, %p4152_p3 }
 0x937   : > { %p4155_p13 = pnand %p4154_p6, %p4148_p9 }
 0x939   : > { %4158 = shalt.err (!%p4155_p13)
}
 0x93a   : > { %s4268_s15 = smov 128   ;;  %s4269_s12 = smov 256  }
 0x93b   : > { %s4270_s25 = smov 8   ;;  %s4159_s7 = scalar_lea.vmem %s5115_s29, 128 }
 0x93c   : > { %3731 = dma.vmem_to_hbm [thread:$0]  (%p5284_p4), %s5094_s9, 1024, %s5100_s14, %s2758_s17, %s4268_s15, %s4269_s12, %s4270_s25  }
 0x93d   : > { %p4160_p8 = scmp.ne.s32.totalorder %s5115_s29, %s4159_s7  ;;  %s4271_s3 = smov [#allocation17]  }
 0x93e   : > { %s4163_s18 = sshll.u32 %s4271_s3, 4  ;;  %s4164_s18 = int_to_ptr.vmem [resolvable:$false] %s4163_s18 }
 0x93f   : > { %p4161_p0 = pnand %p4160_p8, %p5284_p4  ;;  %s4165_s30 = scalar_lea.vmem %s4164_s18, 256 }
 0x940   : > { %p4166_p12 = scmp.lt.s32.totalorder %s5115_s29, %s4164_s18  ;;  %p4167_p7 = scmp.lt.s32.totalorder %s4165_s30, %s4159_s7 }
 0x941   : > { %p4162_p5 = pneg %p4161_p0 }
 0x942   : > { %p4168_p1 = por %p4167_p7, %p4166_p12 }
 0x944   : > { %p4169_p9 = pnand %p4168_p1, %p4162_p5 }
 0x946   : > { %4172 = shalt.err (!%p4169_p9)
}
 0x947   : > { %s4173_s22 = scalar_lea.hbm %s5113_s23, 128  ;;  %s4177_s17 = scalar_lea.hbm %s5283_s21, 256 }
 0x948   : > { %p4174_p2 = scmp.ne.s32.totalorder %s5113_s23, %s4173_s22  ;;  %p4178_p11 = scmp.lt.u32.totalorder %s5113_s23, %s5283_s21 }
 0x949   : > { %p4179_p6 = scmp.lt.u32.totalorder %s4177_s17, %s4173_s22  ;;  %p4181_p8 = scmp.lt.u32.totalorder %s4173_s22, %s5113_s23 }
 0x94a   : > { %p4175_p10 = pnand %p4174_p2, %p5284_p4 }
 0x94b   : > { %p4180_p13 = por %p4179_p6, %p4178_p11 }
 0x94c   : > { %p4176_p3 = pneg %p4175_p10 }
 0x94d   : > { %p4182_p0 = por %p4181_p8, %p4180_p13 }
 0x94f   : > { %p4183_p5 = pnand %p4182_p0, %p4176_p3 }
 0x951   : > { %4186 = shalt.err (!%p4183_p5)
}
 0x952   : > { %3733 = dma.vmem_to_hbm [thread:$0]  (%p5284_p4), %s5115_s29, 128, %s5113_s23, %s5119_s24  }
 0x953 PF: > { %s5285_s1 = sld [smem:[#allocation23_spill]]  ;;  %s5286_s19 = sld [smem:[#allocation27_spill]] }
 0x954   : > { %s5287_s10 = sld [smem:[#allocation26_spill]] }
 0x959   : > { %s2824_s20 = sand.u32 1, %s5285_s1   ;;  %p5288_p12 = scmp.ne.s32.totalorder %s5286_s19, 0 }
 0x95a   : > { %p5289_p7 = scmp.ge.s32.totalorder %s5287_s10, 2  ;;  %s2825_s27 = scalar_lea.sflag [#allocation7], %s2824_s20 }
 0x95c   : > { %p3755_p1 = pnand %p5289_p7, %p5288_p12 }
 0x95e   : > { %4224 = dma.done.wait (!%p3755_p1), %s2825_s27, 1024  }
 0x95f   : > { %4226 = vsyncadd (!%p3755_p1), %s2825_s27, 4294966272  ;;  %s5290_s11 = sadd.s32 4294967294, %s5287_s10  }
 0x960   : > { %s2833_s15 = sand.u32 1, %s5290_s11  }
 0x961   : > { %s2834_s12 = scalar_lea.sflag [#allocation16], %s2833_s15 }
 0x962   : > { %4228 = dma.done.wait (!%p3755_p1), %s2834_s12, 256  }
 0x963   : > { %4230 = vsyncadd (!%p3755_p1), %s2834_s12, 4294967040  ;;  %s32_s10 = sadd.s32 1, %s5287_s10   ;;  %s5291_s26 = sld [smem:[#allocation24_spill]] }
 0x964   : > { %p29_p4 = scmp.ge.s32.totalorder %s32_s10, 4   ;;  %s5292_s29 = sld [smem:[#allocation29_spill]] }
 0x965   : > { %s5293_s30 = sld [smem:[#allocation25_spill]]  ;;  %s5294_s9 = sld [smem:[#allocation28_spill]] }
 0x966   : > { %s5295_s27 = smov %s4237_s28  ;;  %31 = sbr.rel (!%p29_p4) target bundleno = 16 (0x10), region = 175 }
 0x969   : > { %s5296_s28 = smov %s5291_s26 }
 0x96d   :  { %2848 = vsyncpa [#allocation6], 1 }
 0x96e   :  { %2850 = vsyncpa [#allocation6 + $0x1], 1 }
 0x96f   :  { %2851 = vsyncpa [#allocation9], 1 }
 0x970   :  { %2853 = vsyncpa [#allocation9 + $0x1], 1 }
 0x971   :  { %2854 = vsyncpa [#allocation12], 1 }
 0x972   :  { %2855 = vsyncpa [#allocation7], 1 }
 0x973   :  { %2857 = vsyncpa [#allocation7 + $0x1], 1 }
 0x974   :  { %2858 = vsyncpa [#allocation16], 1 }
 0x975   :  { %2860 = vsyncpa [#allocation16 + $0x1], 1 }

</bundles_post_ra>
